<compile_context>
chip_gen: v7x
topology: tpu7x:2x2x1
jax: 0.10.0
libtpu: 0.0.40
codegen_flags: <defaults>
</compile_context>

<pallas_src>
import functools

import jax
import jax.numpy as jnp
from jax import lax
from jax.experimental import pallas as pl
from jax.experimental.pallas import tpu as pltpu


# ----------------------------------------------------------------------------- kernel
def atten_gru_kernel(T, B, F, H,
                     x_ref,        # (T*B, F)  time-major input, rows [t*B:(t+1)*B] = x_t
                     wih0_ref,     # (F, 3H)
                     gbias0_ref,   # (1, 3H)   = b_ih0 + [b_hh0_r, b_hh0_z, 0]
                     whh0_ref,     # (H, 3H)
                     bhh0n_ref,    # (1, H)    = b_hh0_n  (must stay inside r * (.))
                     wf1t_ref,     # (H, 4H)   = [wih1_rz | wih1_n | 0]      (applied to new h1)
                     wf1b_ref,     # (H, 4H)   = [whh1_rz | 0     | whh1_n]  (applied to old h2)
                     bf1_ref,      # (1, 4H)   = [bih1_rz + bhh1_rz | bih1_n | bhh1_n]
                     attW_ref,     # (H, H)
                     attB_ref,     # (1, H)
                     attV_ref,     # (1, H)
                     fcw_ref,      # (H, C)
                     fcb_ref,      # (1, C)
                     out_ref):     # (B, C)
    f32 = jnp.float32
    TB = T * B

    # ---- recurrence weights / small vectors loaded + broadcast ONCE before the loop ----
    # (attention / fc weights are intentionally NOT loaded here: they are epilogue-only,
    #  keeping them out of the unrolled loop's live ranges.)
    whh0 = whh0_ref[...]
    wf1_top = wf1t_ref[...]
    wf1_bot = wf1b_ref[...]
    bhh0n = jnp.broadcast_to(bhh0n_ref[...], (B, H))
    bf1 = jnp.broadcast_to(bf1_ref[...], (B, 4 * H))

    # ---- hoisted layer-0 input projection: ONE (T*B,F)@(F,3H) matmul --------------------
    gx0_all = jnp.dot(x_ref[...], wih0_ref[...],
                      preferred_element_type=f32) + gbias0_ref[...]          # (T*B, 3H)
    # extract per-step rows up front so the sublane extract is off the per-step chain
    gx0_steps = [gx0_all[t * B:(t + 1) * B, :] for t in range(T)]

    h1 = jnp.zeros((B, H), f32)          # nn.GRU default h0 = zeros
    h2 = jnp.zeros((B, H), f32)
    h2_steps = []                        # deferred-attention stash (~1 vreg / step)

    for t in range(T):                   # static unroll: T is a small compile-time const
        gx0 = gx0_steps[t]

        # ---- matmuls that depend ONLY on last step's state: issue first (overlap) ------
        g1_bot = jnp.dot(h2, wf1_bot, preferred_element_type=f32) + bf1      # (B, 4H)
        gh0 = jnp.dot(h1, whh0, preferred_element_type=f32)                  # (B, 3H)

        # ---- GRU layer 0 (r/z sigmoids fused into one EUP launch) ----------------------
        rz0 = jax.nn.sigmoid(gx0[:, :2 * H] + gh0[:, :2 * H])
        r0 = rz0[:, :H]
        z0 = rz0[:, H:]
        n0 = jnp.tanh(gx0[:, 2 * H:] + r0 * (gh0[:, 2 * H:] + bhh0n))
        h1 = (1.0 - z0) * n0 + z0 * h1
        # TODO(synk): nn.GRU(dropout=0.2) is train-time only; omitted (inference).

        # ---- GRU layer 1: only the h1_new half of the split matmul is on the chain -----
        g1 = jnp.dot(h1, wf1_top, preferred_element_type=f32) + g1_bot       # (B, 4H)
        rz1 = jax.nn.sigmoid(g1[:, :2 * H])
        r1 = rz1[:, :H]
        z1 = rz1[:, H:]
        n1 = jnp.tanh(g1[:, 2 * H:3 * H] + r1 * g1[:, 3 * H:])
        h2 = (1.0 - z1) * n1 + z1 * h2

        h2_steps.append(h2)

    # ---- deferred soft attention (single batched matmul + softmax over T) --------------
    attW = attW_ref[...]
    attB = jnp.broadcast_to(attB_ref[...], (TB, H))
    attV = jnp.broadcast_to(attV_ref[...], (TB, H))

    hseq = jnp.concatenate(h2_steps, axis=0)                                 # (T*B, H)
    pre = jnp.tanh(jnp.dot(hseq, attW, preferred_element_type=f32) + attB)
    scores = jnp.sum(pre * attV, axis=-1, keepdims=True)                     # (T*B, 1)
    s_steps = [scores[t * B:(t + 1) * B, :] for t in range(T)]               # T x (B,1)

    m = s_steps[0]
    for t in range(1, T):
        m = jnp.maximum(m, s_steps[t])
    e_steps = [jnp.exp(s - m) for s in s_steps]

    denom = e_steps[0]
    acc = e_steps[0] * h2_steps[0]
    for t in range(1, T):
        denom = denom + e_steps[t]
        acc = acc + e_steps[t] * h2_steps[t]

    # denom >= 1 (one exp(0) term), so the approx reciprocal is safe; ~2^-12 rel error.
    attn = acc * pl.reciprocal(denom, approx=True)                           # (B, H)

    out = jnp.dot(attn, fcw_ref[...], preferred_element_type=f32) + fcb_ref[...]
    out_ref[...] = out.astype(out_ref.dtype)


# ---------------------------------------------------------------------------- wrapper
def atten_gru_forward(x, p):
    """x: (B, 1, T, F)  -> (logits, logits) with logits (B, n_classes)."""
    B, C, T, F = x.shape
    assert C == 1, "module's reshape requires a singleton channel dim"
    H = p["whh0"].shape[0]
    n_classes = p["fcw"].shape[1]

    # time-major, row-flattened input: rows [t*B:(t+1)*B] hold x_t
    # (plain-JAX glue mirroring the PyTorch reshape + transpose)
    x_tb = jnp.transpose(x.reshape(B, T, F), (1, 0, 2)).reshape(T * B, F).astype(jnp.float32)

    # ---- fold biases / build split layer-1 weights (tiny prep, outside the kernel) -----
    zH = jnp.zeros((1, H), jnp.float32)
    gbias0 = p["bih0"] + jnp.concatenate([p["bhh0"][:, :2 * H], zH], axis=1)   # (1, 3H)
    bhh0n = p["bhh0"][:, 2 * H:]                                               # (1, H)

    zHH = jnp.zeros((H, H), jnp.float32)
    wf1_top = jnp.concatenate([p["wih1"], zHH], axis=1)                        # (H, 4H)
    wf1_bot = jnp.concatenate([p["whh1"][:, :2 * H], zHH, p["whh1"][:, 2 * H:]],
                              axis=1)                                          # (H, 4H)
    bf1 = jnp.concatenate([p["bih1"][:, :2 * H] + p["bhh1"][:, :2 * H],
                           p["bih1"][:, 2 * H:], p["bhh1"][:, 2 * H:]], axis=1)  # (1, 4H)

    kernel = functools.partial(atten_gru_kernel, T, B, F, H)
    inputs = (x_tb,
              p["wih0"], gbias0, p["whh0"], bhh0n,
              wf1_top, wf1_bot, bf1,
              p["attW"], p["attB"], p["attV"],
              p["fcw"], p["fcb"])

    out = pl.pallas_call(
        kernel,
        out_shape=jax.ShapeDtypeStruct((B, n_classes), jnp.float32),
        in_specs=[pl.BlockSpec(memory_space=pltpu.MemorySpace.VMEM)] * len(inputs),
        out_specs=pl.BlockSpec(memory_space=pltpu.MemorySpace.VMEM),
    )(*inputs)
    return out, out


# --------------------------------------------------------------------------- params
def init_params(key, input_dim, hidden_dim, n_classes):
    F, H = input_dim, hidden_dim
    ks = jax.random.split(key, 16)
    kgru = 1.0 / jnp.sqrt(H)

    def u(k, shape, lim):
        return jax.random.uniform(k, shape, jnp.float32, -lim, lim)

    # raw PyTorch-shaped parameters
    w_ih0 = u(ks[0], (3 * H, F), kgru); w_hh0 = u(ks[1], (3 * H, H), kgru)
    b_ih0 = u(ks[2], (3 * H,), kgru);   b_hh0 = u(ks[3], (3 * H,), kgru)
    w_ih1 = u(ks[4], (3 * H, H), kgru); w_hh1 = u(ks[5], (3 * H, H), kgru)
    b_ih1 = u(ks[6], (3 * H,), kgru);   b_hh1 = u(ks[7], (3 * H,), kgru)
    att_W = u(ks[8], (H, H), 0.1)
    att_v = u(ks[9], (H, 1), 0.1)
    att_b = jnp.zeros((H, 1), jnp.float32)
    fc_w = u(ks[10], (n_classes, H), kgru)
    fc_b = u(ks[11], (n_classes,), kgru)

    # kernel-friendly layout (pre-transposed, 2-D biases)
    return dict(
        wih0=w_ih0.T, whh0=w_hh0.T, bih0=b_ih0[None, :], bhh0=b_hh0[None, :],
        wih1=w_ih1.T, whh1=w_hh1.T, bih1=b_ih1[None, :], bhh1=b_hh1[None, :],
        attW=att_W, attB=att_b[:, 0][None, :], attV=att_v[:, 0][None, :],
        fcw=fc_w.T, fcb=fc_b[None, :],
    )


# ----------------------------------------------------------------------- pure-JAX ref
def reference_forward(x, p):
    B, C, T, F = x.shape
    xt = jnp.transpose(x.reshape(B, T, F), (1, 0, 2))
    H = p["whh0"].shape[0]

    def cell(xv, h, wih, whh, bih, bhh):
        gx = xv @ wih + bih
        gh = h @ whh + bhh
        r = jax.nn.sigmoid(gx[:, :H] + gh[:, :H])
        z = jax.nn.sigmoid(gx[:, H:2 * H] + gh[:, H:2 * H])
        n = jnp.tanh(gx[:, 2 * H:] + r * gh[:, 2 * H:])
        return (1.0 - z) * n + z * h

    def scan_fn(carry, x_t):
        h1, h2 = carry
        h1 = cell(x_t, h1, p["wih0"], p["whh0"], p["bih0"], p["bhh0"])
        h2 = cell(h1, h2, p["wih1"], p["whh1"], p["bih1"], p["bhh1"])
        return (h1, h2), h2

    h0 = jnp.zeros((B, H), jnp.float32)
    _, hs = lax.scan(scan_fn, (h0, h0), xt)                        # (T, B, H)
    pre = jnp.tanh(jnp.einsum("tbh,hk->tbk", hs, p["attW"]) + p["attB"][None])
    scores = jnp.sum(pre * p["attV"][None], axis=-1)               # (T, B)
    soft = jax.nn.softmax(scores, axis=0)
    attn = jnp.sum(soft[:, :, None] * hs, axis=0)                  # (B, H)
    return attn @ p["fcw"] + p["fcb"]


# ----------------------------------------------------------------------------- main
if __name__ == "__main__":
    B, C, T, F = 2, 1, 8, 16
    H, n_classes = 32, 2

    key = jax.random.PRNGKey(0)
    kx, kp = jax.random.split(key)
    x = jax.random.normal(kx, (B, C, T, F), jnp.float32)
    params = init_params(kp, F, H, n_classes)

    out, out2 = jax.jit(atten_gru_forward)(x, params)
    out = jax.block_until_ready(out)

    ref = reference_forward(x, params)
    assert out.shape == (B, n_classes)
    assert jnp.allclose(out, ref, rtol=1e-2, atol=1e-2), "mismatch vs JAX reference"
    print("KERNEL_OK")
</pallas_src>

<mosaic_0001>
module attributes {stable_mosaic.version = 11 : i64} {
  func.func @atten_gru_kernel(%arg0: memref<16x16xf32, #tpu.memory_space<vmem>>, %arg1: memref<16x96xf32, #tpu.memory_space<vmem>>, %arg2: memref<1x96xf32, #tpu.memory_space<vmem>>, %arg3: memref<32x96xf32, #tpu.memory_space<vmem>>, %arg4: memref<1x32xf32, #tpu.memory_space<vmem>>, %arg5: memref<32x128xf32, #tpu.memory_space<vmem>>, %arg6: memref<32x128xf32, #tpu.memory_space<vmem>>, %arg7: memref<1x128xf32, #tpu.memory_space<vmem>>, %arg8: memref<32x32xf32, #tpu.memory_space<vmem>>, %arg9: memref<1x32xf32, #tpu.memory_space<vmem>>, %arg10: memref<1x32xf32, #tpu.memory_space<vmem>>, %arg11: memref<32x2xf32, #tpu.memory_space<vmem>>, %arg12: memref<1x2xf32, #tpu.memory_space<vmem>>, %arg13: memref<2x2xf32, #tpu.memory_space<vmem>>) attributes {dimension_semantics = [], scalar_prefetch = 0 : i64, scratch_operands = 0 : i64, tpu.core_type = #tpu.core_type<tc>} {
    %c0 = arith.constant 0 : index
    %c0_0 = arith.constant 0 : index
    %0 = vector.load %arg3[%c0, %c0_0] : memref<32x96xf32, #tpu.memory_space<vmem>>, vector<32x96xf32>
    %c0_1 = arith.constant 0 : index
    %c0_2 = arith.constant 0 : index
    %1 = vector.load %arg5[%c0_1, %c0_2] : memref<32x128xf32, #tpu.memory_space<vmem>>, vector<32x128xf32>
    %c0_3 = arith.constant 0 : index
    %c0_4 = arith.constant 0 : index
    %2 = vector.load %arg6[%c0_3, %c0_4] : memref<32x128xf32, #tpu.memory_space<vmem>>, vector<32x128xf32>
    %c0_5 = arith.constant 0 : index
    %c0_6 = arith.constant 0 : index
    %3 = vector.load %arg4[%c0_5, %c0_6] : memref<1x32xf32, #tpu.memory_space<vmem>>, vector<1x32xf32>
    %4 = vector.shape_cast %3 : vector<1x32xf32> to vector<1x32xf32>
    %5 = vector.broadcast %4 : vector<1x32xf32> to vector<2x32xf32>
    %c0_7 = arith.constant 0 : index
    %c0_8 = arith.constant 0 : index
    %6 = vector.load %arg7[%c0_7, %c0_8] : memref<1x128xf32, #tpu.memory_space<vmem>>, vector<1x128xf32>
    %7 = vector.shape_cast %6 : vector<1x128xf32> to vector<1x128xf32>
    %8 = vector.broadcast %7 : vector<1x128xf32> to vector<2x128xf32>
    %c0_9 = arith.constant 0 : index
    %c0_10 = arith.constant 0 : index
    %9 = vector.load %arg0[%c0_9, %c0_10] : memref<16x16xf32, #tpu.memory_space<vmem>>, vector<16x16xf32>
    %c0_11 = arith.constant 0 : index
    %c0_12 = arith.constant 0 : index
    %10 = vector.load %arg1[%c0_11, %c0_12] : memref<16x96xf32, #tpu.memory_space<vmem>>, vector<16x96xf32>
    %cst = arith.constant dense<0.000000e+00> : vector<16x96xf32>
    %11 = tpu.matmul %9, %10, %cst {dimension_numbers = #tpu.dot_dimension_numbers<[1], [0], [0], [1], [0, 0, 1, 1], [], []>} : vector<16x16xf32>, vector<16x96xf32>, vector<16x96xf32> -> vector<16x96xf32>
    %c0_13 = arith.constant 0 : index
    %c0_14 = arith.constant 0 : index
    %12 = vector.load %arg2[%c0_13, %c0_14] : memref<1x96xf32, #tpu.memory_space<vmem>>, vector<1x96xf32>
    %13 = vector.broadcast %12 : vector<1x96xf32> to vector<16x96xf32>
    %14 = arith.addf %11, %13 : vector<16x96xf32>
    %15 = vector.extract_strided_slice %14 {offsets = [0, 0], sizes = [2, 96], strides = [1, 1]} : vector<16x96xf32> to vector<2x96xf32>
    %16 = vector.extract_strided_slice %14 {offsets = [2, 0], sizes = [2, 96], strides = [1, 1]} : vector<16x96xf32> to vector<2x96xf32>
    %17 = vector.extract_strided_slice %14 {offsets = [4, 0], sizes = [2, 96], strides = [1, 1]} : vector<16x96xf32> to vector<2x96xf32>
    %18 = vector.extract_strided_slice %14 {offsets = [6, 0], sizes = [2, 96], strides = [1, 1]} : vector<16x96xf32> to vector<2x96xf32>
    %19 = vector.extract_strided_slice %14 {offsets = [8, 0], sizes = [2, 96], strides = [1, 1]} : vector<16x96xf32> to vector<2x96xf32>
    %20 = vector.extract_strided_slice %14 {offsets = [10, 0], sizes = [2, 96], strides = [1, 1]} : vector<16x96xf32> to vector<2x96xf32>
    %21 = vector.extract_strided_slice %14 {offsets = [12, 0], sizes = [2, 96], strides = [1, 1]} : vector<16x96xf32> to vector<2x96xf32>
    %22 = vector.extract_strided_slice %14 {offsets = [14, 0], sizes = [2, 96], strides = [1, 1]} : vector<16x96xf32> to vector<2x96xf32>
    %cst_15 = arith.constant 0.000000e+00 : f32
    %23 = vector.broadcast %cst_15 : f32 to vector<2x32xf32>
    %cst_16 = arith.constant 0.000000e+00 : f32
    %24 = vector.broadcast %cst_16 : f32 to vector<2x32xf32>
    %cst_17 = arith.constant dense<0.000000e+00> : vector<2x128xf32>
    %25 = tpu.matmul %24, %2, %cst_17 {dimension_numbers = #tpu.dot_dimension_numbers<[1], [0], [0], [1], [0, 0, 1, 1], [], []>} : vector<2x32xf32>, vector<32x128xf32>, vector<2x128xf32> -> vector<2x128xf32>
    %26 = arith.addf %25, %8 : vector<2x128xf32>
    %cst_18 = arith.constant dense<0.000000e+00> : vector<2x96xf32>
    %27 = tpu.matmul %23, %0, %cst_18 {dimension_numbers = #tpu.dot_dimension_numbers<[1], [0], [0], [1], [0, 0, 1, 1], [], []>} : vector<2x32xf32>, vector<32x96xf32>, vector<2x96xf32> -> vector<2x96xf32>
    %28 = vector.extract_strided_slice %15 {offsets = [0, 0], sizes = [2, 64], strides = [1, 1]} : vector<2x96xf32> to vector<2x64xf32>
    %29 = vector.extract_strided_slice %27 {offsets = [0, 0], sizes = [2, 64], strides = [1, 1]} : vector<2x96xf32> to vector<2x64xf32>
    %30 = arith.addf %28, %29 : vector<2x64xf32>
    %31 = arith.negf %30 : vector<2x64xf32>
    %32 = math.exp %31 : vector<2x64xf32>
    %cst_19 = arith.constant 1.000000e+00 : f32
    %33 = vector.broadcast %cst_19 : f32 to vector<2x64xf32>
    %34 = arith.addf %33, %32 : vector<2x64xf32>
    %35 = arith.divf %33, %34 : vector<2x64xf32>
    %36 = vector.extract_strided_slice %35 {offsets = [0, 0], sizes = [2, 32], strides = [1, 1]} : vector<2x64xf32> to vector<2x32xf32>
    %37 = vector.extract_strided_slice %35 {offsets = [0, 32], sizes = [2, 32], strides = [1, 1]} : vector<2x64xf32> to vector<2x32xf32>
    %38 = vector.extract_strided_slice %15 {offsets = [0, 64], sizes = [2, 32], strides = [1, 1]} : vector<2x96xf32> to vector<2x32xf32>
    %39 = vector.extract_strided_slice %27 {offsets = [0, 64], sizes = [2, 32], strides = [1, 1]} : vector<2x96xf32> to vector<2x32xf32>
    %40 = arith.addf %39, %5 : vector<2x32xf32>
    %41 = arith.mulf %36, %40 : vector<2x32xf32>
    %42 = arith.addf %38, %41 : vector<2x32xf32>
    %43 = math.tanh %42 : vector<2x32xf32>
    %cst_20 = arith.constant 1.000000e+00 : f32
    %44 = vector.broadcast %cst_20 : f32 to vector<2x32xf32>
    %45 = arith.subf %44, %37 : vector<2x32xf32>
    %46 = arith.mulf %45, %43 : vector<2x32xf32>
    %47 = arith.mulf %37, %23 : vector<2x32xf32>
    %48 = arith.addf %46, %47 : vector<2x32xf32>
    %cst_21 = arith.constant dense<0.000000e+00> : vector<2x128xf32>
    %49 = tpu.matmul %48, %1, %cst_21 {dimension_numbers = #tpu.dot_dimension_numbers<[1], [0], [0], [1], [0, 0, 1, 1], [], []>} : vector<2x32xf32>, vector<32x128xf32>, vector<2x128xf32> -> vector<2x128xf32>
    %50 = arith.addf %49, %26 : vector<2x128xf32>
    %51 = vector.extract_strided_slice %50 {offsets = [0, 0], sizes = [2, 64], strides = [1, 1]} : vector<2x128xf32> to vector<2x64xf32>
    %52 = arith.negf %51 : vector<2x64xf32>
    %53 = math.exp %52 : vector<2x64xf32>
    %cst_22 = arith.constant 1.000000e+00 : f32
    %54 = vector.broadcast %cst_22 : f32 to vector<2x64xf32>
    %55 = arith.addf %54, %53 : vector<2x64xf32>
    %56 = arith.divf %54, %55 : vector<2x64xf32>
    %57 = vector.extract_strided_slice %56 {offsets = [0, 0], sizes = [2, 32], strides = [1, 1]} : vector<2x64xf32> to vector<2x32xf32>
    %58 = vector.extract_strided_slice %56 {offsets = [0, 32], sizes = [2, 32], strides = [1, 1]} : vector<2x64xf32> to vector<2x32xf32>
    %59 = vector.extract_strided_slice %50 {offsets = [0, 64], sizes = [2, 32], strides = [1, 1]} : vector<2x128xf32> to vector<2x32xf32>
    %60 = vector.extract_strided_slice %50 {offsets = [0, 96], sizes = [2, 32], strides = [1, 1]} : vector<2x128xf32> to vector<2x32xf32>
    %61 = arith.mulf %57, %60 : vector<2x32xf32>
    %62 = arith.addf %59, %61 : vector<2x32xf32>
    %63 = math.tanh %62 : vector<2x32xf32>
    %cst_23 = arith.constant 1.000000e+00 : f32
    %64 = vector.broadcast %cst_23 : f32 to vector<2x32xf32>
    %65 = arith.subf %64, %58 : vector<2x32xf32>
    %66 = arith.mulf %65, %63 : vector<2x32xf32>
    %67 = arith.mulf %58, %24 : vector<2x32xf32>
    %68 = arith.addf %66, %67 : vector<2x32xf32>
    %cst_24 = arith.constant dense<0.000000e+00> : vector<2x128xf32>
    %69 = tpu.matmul %68, %2, %cst_24 {dimension_numbers = #tpu.dot_dimension_numbers<[1], [0], [0], [1], [0, 0, 1, 1], [], []>} : vector<2x32xf32>, vector<32x128xf32>, vector<2x128xf32> -> vector<2x128xf32>
    %70 = arith.addf %69, %8 : vector<2x128xf32>
    %cst_25 = arith.constant dense<0.000000e+00> : vector<2x96xf32>
    %71 = tpu.matmul %48, %0, %cst_25 {dimension_numbers = #tpu.dot_dimension_numbers<[1], [0], [0], [1], [0, 0, 1, 1], [], []>} : vector<2x32xf32>, vector<32x96xf32>, vector<2x96xf32> -> vector<2x96xf32>
    %72 = vector.extract_strided_slice %16 {offsets = [0, 0], sizes = [2, 64], strides = [1, 1]} : vector<2x96xf32> to vector<2x64xf32>
    %73 = vector.extract_strided_slice %71 {offsets = [0, 0], sizes = [2, 64], strides = [1, 1]} : vector<2x96xf32> to vector<2x64xf32>
    %74 = arith.addf %72, %73 : vector<2x64xf32>
    %75 = arith.negf %74 : vector<2x64xf32>
    %76 = math.exp %75 : vector<2x64xf32>
    %cst_26 = arith.constant 1.000000e+00 : f32
    %77 = vector.broadcast %cst_26 : f32 to vector<2x64xf32>
    %78 = arith.addf %77, %76 : vector<2x64xf32>
    %79 = arith.divf %77, %78 : vector<2x64xf32>
    %80 = vector.extract_strided_slice %79 {offsets = [0, 0], sizes = [2, 32], strides = [1, 1]} : vector<2x64xf32> to vector<2x32xf32>
    %81 = vector.extract_strided_slice %79 {offsets = [0, 32], sizes = [2, 32], strides = [1, 1]} : vector<2x64xf32> to vector<2x32xf32>
    %82 = vector.extract_strided_slice %16 {offsets = [0, 64], sizes = [2, 32], strides = [1, 1]} : vector<2x96xf32> to vector<2x32xf32>
    %83 = vector.extract_strided_slice %71 {offsets = [0, 64], sizes = [2, 32], strides = [1, 1]} : vector<2x96xf32> to vector<2x32xf32>
    %84 = arith.addf %83, %5 : vector<2x32xf32>
    %85 = arith.mulf %80, %84 : vector<2x32xf32>
    %86 = arith.addf %82, %85 : vector<2x32xf32>
    %87 = math.tanh %86 : vector<2x32xf32>
    %cst_27 = arith.constant 1.000000e+00 : f32
    %88 = vector.broadcast %cst_27 : f32 to vector<2x32xf32>
    %89 = arith.subf %88, %81 : vector<2x32xf32>
    %90 = arith.mulf %89, %87 : vector<2x32xf32>
    %91 = arith.mulf %81, %48 : vector<2x32xf32>
    %92 = arith.addf %90, %91 : vector<2x32xf32>
    %cst_28 = arith.constant dense<0.000000e+00> : vector<2x128xf32>
    %93 = tpu.matmul %92, %1, %cst_28 {dimension_numbers = #tpu.dot_dimension_numbers<[1], [0], [0], [1], [0, 0, 1, 1], [], []>} : vector<2x32xf32>, vector<32x128xf32>, vector<2x128xf32> -> vector<2x128xf32>
    %94 = arith.addf %93, %70 : vector<2x128xf32>
    %95 = vector.extract_strided_slice %94 {offsets = [0, 0], sizes = [2, 64], strides = [1, 1]} : vector<2x128xf32> to vector<2x64xf32>
    %96 = arith.negf %95 : vector<2x64xf32>
    %97 = math.exp %96 : vector<2x64xf32>
    %cst_29 = arith.constant 1.000000e+00 : f32
    %98 = vector.broadcast %cst_29 : f32 to vector<2x64xf32>
    %99 = arith.addf %98, %97 : vector<2x64xf32>
    %100 = arith.divf %98, %99 : vector<2x64xf32>
    %101 = vector.extract_strided_slice %100 {offsets = [0, 0], sizes = [2, 32], strides = [1, 1]} : vector<2x64xf32> to vector<2x32xf32>
    %102 = vector.extract_strided_slice %100 {offsets = [0, 32], sizes = [2, 32], strides = [1, 1]} : vector<2x64xf32> to vector<2x32xf32>
    %103 = vector.extract_strided_slice %94 {offsets = [0, 64], sizes = [2, 32], strides = [1, 1]} : vector<2x128xf32> to vector<2x32xf32>
    %104 = vector.extract_strided_slice %94 {offsets = [0, 96], sizes = [2, 32], strides = [1, 1]} : vector<2x128xf32> to vector<2x32xf32>
    %105 = arith.mulf %101, %104 : vector<2x32xf32>
    %106 = arith.addf %103, %105 : vector<2x32xf32>
    %107 = math.tanh %106 : vector<2x32xf32>
    %cst_30 = arith.constant 1.000000e+00 : f32
    %108 = vector.broadcast %cst_30 : f32 to vector<2x32xf32>
    %109 = arith.subf %108, %102 : vector<2x32xf32>
    %110 = arith.mulf %109, %107 : vector<2x32xf32>
    %111 = arith.mulf %102, %68 : vector<2x32xf32>
    %112 = arith.addf %110, %111 : vector<2x32xf32>
    %cst_31 = arith.constant dense<0.000000e+00> : vector<2x128xf32>
    %113 = tpu.matmul %112, %2, %cst_31 {dimension_numbers = #tpu.dot_dimension_numbers<[1], [0], [0], [1], [0, 0, 1, 1], [], []>} : vector<2x32xf32>, vector<32x128xf32>, vector<2x128xf32> -> vector<2x128xf32>
    %114 = arith.addf %113, %8 : vector<2x128xf32>
    %cst_32 = arith.constant dense<0.000000e+00> : vector<2x96xf32>
    %115 = tpu.matmul %92, %0, %cst_32 {dimension_numbers = #tpu.dot_dimension_numbers<[1], [0], [0], [1], [0, 0, 1, 1], [], []>} : vector<2x32xf32>, vector<32x96xf32>, vector<2x96xf32> -> vector<2x96xf32>
    %116 = vector.extract_strided_slice %17 {offsets = [0, 0], sizes = [2, 64], strides = [1, 1]} : vector<2x96xf32> to vector<2x64xf32>
    %117 = vector.extract_strided_slice %115 {offsets = [0, 0], sizes = [2, 64], strides = [1, 1]} : vector<2x96xf32> to vector<2x64xf32>
    %118 = arith.addf %116, %117 : vector<2x64xf32>
    %119 = arith.negf %118 : vector<2x64xf32>
    %120 = math.exp %119 : vector<2x64xf32>
    %cst_33 = arith.constant 1.000000e+00 : f32
    %121 = vector.broadcast %cst_33 : f32 to vector<2x64xf32>
    %122 = arith.addf %121, %120 : vector<2x64xf32>
    %123 = arith.divf %121, %122 : vector<2x64xf32>
    %124 = vector.extract_strided_slice %123 {offsets = [0, 0], sizes = [2, 32], strides = [1, 1]} : vector<2x64xf32> to vector<2x32xf32>
    %125 = vector.extract_strided_slice %123 {offsets = [0, 32], sizes = [2, 32], strides = [1, 1]} : vector<2x64xf32> to vector<2x32xf32>
    %126 = vector.extract_strided_slice %17 {offsets = [0, 64], sizes = [2, 32], strides = [1, 1]} : vector<2x96xf32> to vector<2x32xf32>
    %127 = vector.extract_strided_slice %115 {offsets = [0, 64], sizes = [2, 32], strides = [1, 1]} : vector<2x96xf32> to vector<2x32xf32>
    %128 = arith.addf %127, %5 : vector<2x32xf32>
    %129 = arith.mulf %124, %128 : vector<2x32xf32>
    %130 = arith.addf %126, %129 : vector<2x32xf32>
    %131 = math.tanh %130 : vector<2x32xf32>
    %cst_34 = arith.constant 1.000000e+00 : f32
    %132 = vector.broadcast %cst_34 : f32 to vector<2x32xf32>
    %133 = arith.subf %132, %125 : vector<2x32xf32>
    %134 = arith.mulf %133, %131 : vector<2x32xf32>
    %135 = arith.mulf %125, %92 : vector<2x32xf32>
    %136 = arith.addf %134, %135 : vector<2x32xf32>
    %cst_35 = arith.constant dense<0.000000e+00> : vector<2x128xf32>
    %137 = tpu.matmul %136, %1, %cst_35 {dimension_numbers = #tpu.dot_dimension_numbers<[1], [0], [0], [1], [0, 0, 1, 1], [], []>} : vector<2x32xf32>, vector<32x128xf32>, vector<2x128xf32> -> vector<2x128xf32>
    %138 = arith.addf %137, %114 : vector<2x128xf32>
    %139 = vector.extract_strided_slice %138 {offsets = [0, 0], sizes = [2, 64], strides = [1, 1]} : vector<2x128xf32> to vector<2x64xf32>
    %140 = arith.negf %139 : vector<2x64xf32>
    %141 = math.exp %140 : vector<2x64xf32>
    %cst_36 = arith.constant 1.000000e+00 : f32
    %142 = vector.broadcast %cst_36 : f32 to vector<2x64xf32>
    %143 = arith.addf %142, %141 : vector<2x64xf32>
    %144 = arith.divf %142, %143 : vector<2x64xf32>
    %145 = vector.extract_strided_slice %144 {offsets = [0, 0], sizes = [2, 32], strides = [1, 1]} : vector<2x64xf32> to vector<2x32xf32>
    %146 = vector.extract_strided_slice %144 {offsets = [0, 32], sizes = [2, 32], strides = [1, 1]} : vector<2x64xf32> to vector<2x32xf32>
    %147 = vector.extract_strided_slice %138 {offsets = [0, 64], sizes = [2, 32], strides = [1, 1]} : vector<2x128xf32> to vector<2x32xf32>
    %148 = vector.extract_strided_slice %138 {offsets = [0, 96], sizes = [2, 32], strides = [1, 1]} : vector<2x128xf32> to vector<2x32xf32>
    %149 = arith.mulf %145, %148 : vector<2x32xf32>
    %150 = arith.addf %147, %149 : vector<2x32xf32>
    %151 = math.tanh %150 : vector<2x32xf32>
    %cst_37 = arith.constant 1.000000e+00 : f32
    %152 = vector.broadcast %cst_37 : f32 to vector<2x32xf32>
    %153 = arith.subf %152, %146 : vector<2x32xf32>
    %154 = arith.mulf %153, %151 : vector<2x32xf32>
    %155 = arith.mulf %146, %112 : vector<2x32xf32>
    %156 = arith.addf %154, %155 : vector<2x32xf32>
    %cst_38 = arith.constant dense<0.000000e+00> : vector<2x128xf32>
    %157 = tpu.matmul %156, %2, %cst_38 {dimension_numbers = #tpu.dot_dimension_numbers<[1], [0], [0], [1], [0, 0, 1, 1], [], []>} : vector<2x32xf32>, vector<32x128xf32>, vector<2x128xf32> -> vector<2x128xf32>
    %158 = arith.addf %157, %8 : vector<2x128xf32>
    %cst_39 = arith.constant dense<0.000000e+00> : vector<2x96xf32>
    %159 = tpu.matmul %136, %0, %cst_39 {dimension_numbers = #tpu.dot_dimension_numbers<[1], [0], [0], [1], [0, 0, 1, 1], [], []>} : vector<2x32xf32>, vector<32x96xf32>, vector<2x96xf32> -> vector<2x96xf32>
    %160 = vector.extract_strided_slice %18 {offsets = [0, 0], sizes = [2, 64], strides = [1, 1]} : vector<2x96xf32> to vector<2x64xf32>
    %161 = vector.extract_strided_slice %159 {offsets = [0, 0], sizes = [2, 64], strides = [1, 1]} : vector<2x96xf32> to vector<2x64xf32>
    %162 = arith.addf %160, %161 : vector<2x64xf32>
    %163 = arith.negf %162 : vector<2x64xf32>
    %164 = math.exp %163 : vector<2x64xf32>
    %cst_40 = arith.constant 1.000000e+00 : f32
    %165 = vector.broadcast %cst_40 : f32 to vector<2x64xf32>
    %166 = arith.addf %165, %164 : vector<2x64xf32>
    %167 = arith.divf %165, %166 : vector<2x64xf32>
    %168 = vector.extract_strided_slice %167 {offsets = [0, 0], sizes = [2, 32], strides = [1, 1]} : vector<2x64xf32> to vector<2x32xf32>
    %169 = vector.extract_strided_slice %167 {offsets = [0, 32], sizes = [2, 32], strides = [1, 1]} : vector<2x64xf32> to vector<2x32xf32>
    %170 = vector.extract_strided_slice %18 {offsets = [0, 64], sizes = [2, 32], strides = [1, 1]} : vector<2x96xf32> to vector<2x32xf32>
    %171 = vector.extract_strided_slice %159 {offsets = [0, 64], sizes = [2, 32], strides = [1, 1]} : vector<2x96xf32> to vector<2x32xf32>
    %172 = arith.addf %171, %5 : vector<2x32xf32>
    %173 = arith.mulf %168, %172 : vector<2x32xf32>
    %174 = arith.addf %170, %173 : vector<2x32xf32>
    %175 = math.tanh %174 : vector<2x32xf32>
    %cst_41 = arith.constant 1.000000e+00 : f32
    %176 = vector.broadcast %cst_41 : f32 to vector<2x32xf32>
    %177 = arith.subf %176, %169 : vector<2x32xf32>
    %178 = arith.mulf %177, %175 : vector<2x32xf32>
    %179 = arith.mulf %169, %136 : vector<2x32xf32>
    %180 = arith.addf %178, %179 : vector<2x32xf32>
    %cst_42 = arith.constant dense<0.000000e+00> : vector<2x128xf32>
    %181 = tpu.matmul %180, %1, %cst_42 {dimension_numbers = #tpu.dot_dimension_numbers<[1], [0], [0], [1], [0, 0, 1, 1], [], []>} : vector<2x32xf32>, vector<32x128xf32>, vector<2x128xf32> -> vector<2x128xf32>
    %182 = arith.addf %181, %158 : vector<2x128xf32>
    %183 = vector.extract_strided_slice %182 {offsets = [0, 0], sizes = [2, 64], strides = [1, 1]} : vector<2x128xf32> to vector<2x64xf32>
    %184 = arith.negf %183 : vector<2x64xf32>
    %185 = math.exp %184 : vector<2x64xf32>
    %cst_43 = arith.constant 1.000000e+00 : f32
    %186 = vector.broadcast %cst_43 : f32 to vector<2x64xf32>
    %187 = arith.addf %186, %185 : vector<2x64xf32>
    %188 = arith.divf %186, %187 : vector<2x64xf32>
    %189 = vector.extract_strided_slice %188 {offsets = [0, 0], sizes = [2, 32], strides = [1, 1]} : vector<2x64xf32> to vector<2x32xf32>
    %190 = vector.extract_strided_slice %188 {offsets = [0, 32], sizes = [2, 32], strides = [1, 1]} : vector<2x64xf32> to vector<2x32xf32>
    %191 = vector.extract_strided_slice %182 {offsets = [0, 64], sizes = [2, 32], strides = [1, 1]} : vector<2x128xf32> to vector<2x32xf32>
    %192 = vector.extract_strided_slice %182 {offsets = [0, 96], sizes = [2, 32], strides = [1, 1]} : vector<2x128xf32> to vector<2x32xf32>
    %193 = arith.mulf %189, %192 : vector<2x32xf32>
    %194 = arith.addf %191, %193 : vector<2x32xf32>
    %195 = math.tanh %194 : vector<2x32xf32>
    %cst_44 = arith.constant 1.000000e+00 : f32
    %196 = vector.broadcast %cst_44 : f32 to vector<2x32xf32>
    %197 = arith.subf %196, %190 : vector<2x32xf32>
    %198 = arith.mulf %197, %195 : vector<2x32xf32>
    %199 = arith.mulf %190, %156 : vector<2x32xf32>
    %200 = arith.addf %198, %199 : vector<2x32xf32>
    %cst_45 = arith.constant dense<0.000000e+00> : vector<2x128xf32>
    %201 = tpu.matmul %200, %2, %cst_45 {dimension_numbers = #tpu.dot_dimension_numbers<[1], [0], [0], [1], [0, 0, 1, 1], [], []>} : vector<2x32xf32>, vector<32x128xf32>, vector<2x128xf32> -> vector<2x128xf32>
    %202 = arith.addf %201, %8 : vector<2x128xf32>
    %cst_46 = arith.constant dense<0.000000e+00> : vector<2x96xf32>
    %203 = tpu.matmul %180, %0, %cst_46 {dimension_numbers = #tpu.dot_dimension_numbers<[1], [0], [0], [1], [0, 0, 1, 1], [], []>} : vector<2x32xf32>, vector<32x96xf32>, vector<2x96xf32> -> vector<2x96xf32>
    %204 = vector.extract_strided_slice %19 {offsets = [0, 0], sizes = [2, 64], strides = [1, 1]} : vector<2x96xf32> to vector<2x64xf32>
    %205 = vector.extract_strided_slice %203 {offsets = [0, 0], sizes = [2, 64], strides = [1, 1]} : vector<2x96xf32> to vector<2x64xf32>
    %206 = arith.addf %204, %205 : vector<2x64xf32>
    %207 = arith.negf %206 : vector<2x64xf32>
    %208 = math.exp %207 : vector<2x64xf32>
    %cst_47 = arith.constant 1.000000e+00 : f32
    %209 = vector.broadcast %cst_47 : f32 to vector<2x64xf32>
    %210 = arith.addf %209, %208 : vector<2x64xf32>
    %211 = arith.divf %209, %210 : vector<2x64xf32>
    %212 = vector.extract_strided_slice %211 {offsets = [0, 0], sizes = [2, 32], strides = [1, 1]} : vector<2x64xf32> to vector<2x32xf32>
    %213 = vector.extract_strided_slice %211 {offsets = [0, 32], sizes = [2, 32], strides = [1, 1]} : vector<2x64xf32> to vector<2x32xf32>
    %214 = vector.extract_strided_slice %19 {offsets = [0, 64], sizes = [2, 32], strides = [1, 1]} : vector<2x96xf32> to vector<2x32xf32>
    %215 = vector.extract_strided_slice %203 {offsets = [0, 64], sizes = [2, 32], strides = [1, 1]} : vector<2x96xf32> to vector<2x32xf32>
    %216 = arith.addf %215, %5 : vector<2x32xf32>
    %217 = arith.mulf %212, %216 : vector<2x32xf32>
    %218 = arith.addf %214, %217 : vector<2x32xf32>
    %219 = math.tanh %218 : vector<2x32xf32>
    %cst_48 = arith.constant 1.000000e+00 : f32
    %220 = vector.broadcast %cst_48 : f32 to vector<2x32xf32>
    %221 = arith.subf %220, %213 : vector<2x32xf32>
    %222 = arith.mulf %221, %219 : vector<2x32xf32>
    %223 = arith.mulf %213, %180 : vector<2x32xf32>
    %224 = arith.addf %222, %223 : vector<2x32xf32>
    %cst_49 = arith.constant dense<0.000000e+00> : vector<2x128xf32>
    %225 = tpu.matmul %224, %1, %cst_49 {dimension_numbers = #tpu.dot_dimension_numbers<[1], [0], [0], [1], [0, 0, 1, 1], [], []>} : vector<2x32xf32>, vector<32x128xf32>, vector<2x128xf32> -> vector<2x128xf32>
    %226 = arith.addf %225, %202 : vector<2x128xf32>
    %227 = vector.extract_strided_slice %226 {offsets = [0, 0], sizes = [2, 64], strides = [1, 1]} : vector<2x128xf32> to vector<2x64xf32>
    %228 = arith.negf %227 : vector<2x64xf32>
    %229 = math.exp %228 : vector<2x64xf32>
    %cst_50 = arith.constant 1.000000e+00 : f32
    %230 = vector.broadcast %cst_50 : f32 to vector<2x64xf32>
    %231 = arith.addf %230, %229 : vector<2x64xf32>
    %232 = arith.divf %230, %231 : vector<2x64xf32>
    %233 = vector.extract_strided_slice %232 {offsets = [0, 0], sizes = [2, 32], strides = [1, 1]} : vector<2x64xf32> to vector<2x32xf32>
    %234 = vector.extract_strided_slice %232 {offsets = [0, 32], sizes = [2, 32], strides = [1, 1]} : vector<2x64xf32> to vector<2x32xf32>
    %235 = vector.extract_strided_slice %226 {offsets = [0, 64], sizes = [2, 32], strides = [1, 1]} : vector<2x128xf32> to vector<2x32xf32>
    %236 = vector.extract_strided_slice %226 {offsets = [0, 96], sizes = [2, 32], strides = [1, 1]} : vector<2x128xf32> to vector<2x32xf32>
    %237 = arith.mulf %233, %236 : vector<2x32xf32>
    %238 = arith.addf %235, %237 : vector<2x32xf32>
    %239 = math.tanh %238 : vector<2x32xf32>
    %cst_51 = arith.constant 1.000000e+00 : f32
    %240 = vector.broadcast %cst_51 : f32 to vector<2x32xf32>
    %241 = arith.subf %240, %234 : vector<2x32xf32>
    %242 = arith.mulf %241, %239 : vector<2x32xf32>
    %243 = arith.mulf %234, %200 : vector<2x32xf32>
    %244 = arith.addf %242, %243 : vector<2x32xf32>
    %cst_52 = arith.constant dense<0.000000e+00> : vector<2x128xf32>
    %245 = tpu.matmul %244, %2, %cst_52 {dimension_numbers = #tpu.dot_dimension_numbers<[1], [0], [0], [1], [0, 0, 1, 1], [], []>} : vector<2x32xf32>, vector<32x128xf32>, vector<2x128xf32> -> vector<2x128xf32>
    %246 = arith.addf %245, %8 : vector<2x128xf32>
    %cst_53 = arith.constant dense<0.000000e+00> : vector<2x96xf32>
    %247 = tpu.matmul %224, %0, %cst_53 {dimension_numbers = #tpu.dot_dimension_numbers<[1], [0], [0], [1], [0, 0, 1, 1], [], []>} : vector<2x32xf32>, vector<32x96xf32>, vector<2x96xf32> -> vector<2x96xf32>
    %248 = vector.extract_strided_slice %20 {offsets = [0, 0], sizes = [2, 64], strides = [1, 1]} : vector<2x96xf32> to vector<2x64xf32>
    %249 = vector.extract_strided_slice %247 {offsets = [0, 0], sizes = [2, 64], strides = [1, 1]} : vector<2x96xf32> to vector<2x64xf32>
    %250 = arith.addf %248, %249 : vector<2x64xf32>
    %251 = arith.negf %250 : vector<2x64xf32>
    %252 = math.exp %251 : vector<2x64xf32>
    %cst_54 = arith.constant 1.000000e+00 : f32
    %253 = vector.broadcast %cst_54 : f32 to vector<2x64xf32>
    %254 = arith.addf %253, %252 : vector<2x64xf32>
    %255 = arith.divf %253, %254 : vector<2x64xf32>
    %256 = vector.extract_strided_slice %255 {offsets = [0, 0], sizes = [2, 32], strides = [1, 1]} : vector<2x64xf32> to vector<2x32xf32>
    %257 = vector.extract_strided_slice %255 {offsets = [0, 32], sizes = [2, 32], strides = [1, 1]} : vector<2x64xf32> to vector<2x32xf32>
    %258 = vector.extract_strided_slice %20 {offsets = [0, 64], sizes = [2, 32], strides = [1, 1]} : vector<2x96xf32> to vector<2x32xf32>
    %259 = vector.extract_strided_slice %247 {offsets = [0, 64], sizes = [2, 32], strides = [1, 1]} : vector<2x96xf32> to vector<2x32xf32>
    %260 = arith.addf %259, %5 : vector<2x32xf32>
    %261 = arith.mulf %256, %260 : vector<2x32xf32>
    %262 = arith.addf %258, %261 : vector<2x32xf32>
    %263 = math.tanh %262 : vector<2x32xf32>
    %cst_55 = arith.constant 1.000000e+00 : f32
    %264 = vector.broadcast %cst_55 : f32 to vector<2x32xf32>
    %265 = arith.subf %264, %257 : vector<2x32xf32>
    %266 = arith.mulf %265, %263 : vector<2x32xf32>
    %267 = arith.mulf %257, %224 : vector<2x32xf32>
    %268 = arith.addf %266, %267 : vector<2x32xf32>
    %cst_56 = arith.constant dense<0.000000e+00> : vector<2x128xf32>
    %269 = tpu.matmul %268, %1, %cst_56 {dimension_numbers = #tpu.dot_dimension_numbers<[1], [0], [0], [1], [0, 0, 1, 1], [], []>} : vector<2x32xf32>, vector<32x128xf32>, vector<2x128xf32> -> vector<2x128xf32>
    %270 = arith.addf %269, %246 : vector<2x128xf32>
    %271 = vector.extract_strided_slice %270 {offsets = [0, 0], sizes = [2, 64], strides = [1, 1]} : vector<2x128xf32> to vector<2x64xf32>
    %272 = arith.negf %271 : vector<2x64xf32>
    %273 = math.exp %272 : vector<2x64xf32>
    %cst_57 = arith.constant 1.000000e+00 : f32
    %274 = vector.broadcast %cst_57 : f32 to vector<2x64xf32>
    %275 = arith.addf %274, %273 : vector<2x64xf32>
    %276 = arith.divf %274, %275 : vector<2x64xf32>
    %277 = vector.extract_strided_slice %276 {offsets = [0, 0], sizes = [2, 32], strides = [1, 1]} : vector<2x64xf32> to vector<2x32xf32>
    %278 = vector.extract_strided_slice %276 {offsets = [0, 32], sizes = [2, 32], strides = [1, 1]} : vector<2x64xf32> to vector<2x32xf32>
    %279 = vector.extract_strided_slice %270 {offsets = [0, 64], sizes = [2, 32], strides = [1, 1]} : vector<2x128xf32> to vector<2x32xf32>
    %280 = vector.extract_strided_slice %270 {offsets = [0, 96], sizes = [2, 32], strides = [1, 1]} : vector<2x128xf32> to vector<2x32xf32>
    %281 = arith.mulf %277, %280 : vector<2x32xf32>
    %282 = arith.addf %279, %281 : vector<2x32xf32>
    %283 = math.tanh %282 : vector<2x32xf32>
    %cst_58 = arith.constant 1.000000e+00 : f32
    %284 = vector.broadcast %cst_58 : f32 to vector<2x32xf32>
    %285 = arith.subf %284, %278 : vector<2x32xf32>
    %286 = arith.mulf %285, %283 : vector<2x32xf32>
    %287 = arith.mulf %278, %244 : vector<2x32xf32>
    %288 = arith.addf %286, %287 : vector<2x32xf32>
    %cst_59 = arith.constant dense<0.000000e+00> : vector<2x128xf32>
    %289 = tpu.matmul %288, %2, %cst_59 {dimension_numbers = #tpu.dot_dimension_numbers<[1], [0], [0], [1], [0, 0, 1, 1], [], []>} : vector<2x32xf32>, vector<32x128xf32>, vector<2x128xf32> -> vector<2x128xf32>
    %290 = arith.addf %289, %8 : vector<2x128xf32>
    %cst_60 = arith.constant dense<0.000000e+00> : vector<2x96xf32>
    %291 = tpu.matmul %268, %0, %cst_60 {dimension_numbers = #tpu.dot_dimension_numbers<[1], [0], [0], [1], [0, 0, 1, 1], [], []>} : vector<2x32xf32>, vector<32x96xf32>, vector<2x96xf32> -> vector<2x96xf32>
    %292 = vector.extract_strided_slice %21 {offsets = [0, 0], sizes = [2, 64], strides = [1, 1]} : vector<2x96xf32> to vector<2x64xf32>
    %293 = vector.extract_strided_slice %291 {offsets = [0, 0], sizes = [2, 64], strides = [1, 1]} : vector<2x96xf32> to vector<2x64xf32>
    %294 = arith.addf %292, %293 : vector<2x64xf32>
    %295 = arith.negf %294 : vector<2x64xf32>
    %296 = math.exp %295 : vector<2x64xf32>
    %cst_61 = arith.constant 1.000000e+00 : f32
    %297 = vector.broadcast %cst_61 : f32 to vector<2x64xf32>
    %298 = arith.addf %297, %296 : vector<2x64xf32>
    %299 = arith.divf %297, %298 : vector<2x64xf32>
    %300 = vector.extract_strided_slice %299 {offsets = [0, 0], sizes = [2, 32], strides = [1, 1]} : vector<2x64xf32> to vector<2x32xf32>
    %301 = vector.extract_strided_slice %299 {offsets = [0, 32], sizes = [2, 32], strides = [1, 1]} : vector<2x64xf32> to vector<2x32xf32>
    %302 = vector.extract_strided_slice %21 {offsets = [0, 64], sizes = [2, 32], strides = [1, 1]} : vector<2x96xf32> to vector<2x32xf32>
    %303 = vector.extract_strided_slice %291 {offsets = [0, 64], sizes = [2, 32], strides = [1, 1]} : vector<2x96xf32> to vector<2x32xf32>
    %304 = arith.addf %303, %5 : vector<2x32xf32>
    %305 = arith.mulf %300, %304 : vector<2x32xf32>
    %306 = arith.addf %302, %305 : vector<2x32xf32>
    %307 = math.tanh %306 : vector<2x32xf32>
    %cst_62 = arith.constant 1.000000e+00 : f32
    %308 = vector.broadcast %cst_62 : f32 to vector<2x32xf32>
    %309 = arith.subf %308, %301 : vector<2x32xf32>
    %310 = arith.mulf %309, %307 : vector<2x32xf32>
    %311 = arith.mulf %301, %268 : vector<2x32xf32>
    %312 = arith.addf %310, %311 : vector<2x32xf32>
    %cst_63 = arith.constant dense<0.000000e+00> : vector<2x128xf32>
    %313 = tpu.matmul %312, %1, %cst_63 {dimension_numbers = #tpu.dot_dimension_numbers<[1], [0], [0], [1], [0, 0, 1, 1], [], []>} : vector<2x32xf32>, vector<32x128xf32>, vector<2x128xf32> -> vector<2x128xf32>
    %314 = arith.addf %313, %290 : vector<2x128xf32>
    %315 = vector.extract_strided_slice %314 {offsets = [0, 0], sizes = [2, 64], strides = [1, 1]} : vector<2x128xf32> to vector<2x64xf32>
    %316 = arith.negf %315 : vector<2x64xf32>
    %317 = math.exp %316 : vector<2x64xf32>
    %cst_64 = arith.constant 1.000000e+00 : f32
    %318 = vector.broadcast %cst_64 : f32 to vector<2x64xf32>
    %319 = arith.addf %318, %317 : vector<2x64xf32>
    %320 = arith.divf %318, %319 : vector<2x64xf32>
    %321 = vector.extract_strided_slice %320 {offsets = [0, 0], sizes = [2, 32], strides = [1, 1]} : vector<2x64xf32> to vector<2x32xf32>
    %322 = vector.extract_strided_slice %320 {offsets = [0, 32], sizes = [2, 32], strides = [1, 1]} : vector<2x64xf32> to vector<2x32xf32>
    %323 = vector.extract_strided_slice %314 {offsets = [0, 64], sizes = [2, 32], strides = [1, 1]} : vector<2x128xf32> to vector<2x32xf32>
    %324 = vector.extract_strided_slice %314 {offsets = [0, 96], sizes = [2, 32], strides = [1, 1]} : vector<2x128xf32> to vector<2x32xf32>
    %325 = arith.mulf %321, %324 : vector<2x32xf32>
    %326 = arith.addf %323, %325 : vector<2x32xf32>
    %327 = math.tanh %326 : vector<2x32xf32>
    %cst_65 = arith.constant 1.000000e+00 : f32
    %328 = vector.broadcast %cst_65 : f32 to vector<2x32xf32>
    %329 = arith.subf %328, %322 : vector<2x32xf32>
    %330 = arith.mulf %329, %327 : vector<2x32xf32>
    %331 = arith.mulf %322, %288 : vector<2x32xf32>
    %332 = arith.addf %330, %331 : vector<2x32xf32>
    %cst_66 = arith.constant dense<0.000000e+00> : vector<2x128xf32>
    %333 = tpu.matmul %332, %2, %cst_66 {dimension_numbers = #tpu.dot_dimension_numbers<[1], [0], [0], [1], [0, 0, 1, 1], [], []>} : vector<2x32xf32>, vector<32x128xf32>, vector<2x128xf32> -> vector<2x128xf32>
    %334 = arith.addf %333, %8 : vector<2x128xf32>
    %cst_67 = arith.constant dense<0.000000e+00> : vector<2x96xf32>
    %335 = tpu.matmul %312, %0, %cst_67 {dimension_numbers = #tpu.dot_dimension_numbers<[1], [0], [0], [1], [0, 0, 1, 1], [], []>} : vector<2x32xf32>, vector<32x96xf32>, vector<2x96xf32> -> vector<2x96xf32>
    %336 = vector.extract_strided_slice %22 {offsets = [0, 0], sizes = [2, 64], strides = [1, 1]} : vector<2x96xf32> to vector<2x64xf32>
    %337 = vector.extract_strided_slice %335 {offsets = [0, 0], sizes = [2, 64], strides = [1, 1]} : vector<2x96xf32> to vector<2x64xf32>
    %338 = arith.addf %336, %337 : vector<2x64xf32>
    %339 = arith.negf %338 : vector<2x64xf32>
    %340 = math.exp %339 : vector<2x64xf32>
    %cst_68 = arith.constant 1.000000e+00 : f32
    %341 = vector.broadcast %cst_68 : f32 to vector<2x64xf32>
    %342 = arith.addf %341, %340 : vector<2x64xf32>
    %343 = arith.divf %341, %342 : vector<2x64xf32>
    %344 = vector.extract_strided_slice %343 {offsets = [0, 0], sizes = [2, 32], strides = [1, 1]} : vector<2x64xf32> to vector<2x32xf32>
    %345 = vector.extract_strided_slice %343 {offsets = [0, 32], sizes = [2, 32], strides = [1, 1]} : vector<2x64xf32> to vector<2x32xf32>
    %346 = vector.extract_strided_slice %22 {offsets = [0, 64], sizes = [2, 32], strides = [1, 1]} : vector<2x96xf32> to vector<2x32xf32>
    %347 = vector.extract_strided_slice %335 {offsets = [0, 64], sizes = [2, 32], strides = [1, 1]} : vector<2x96xf32> to vector<2x32xf32>
    %348 = arith.addf %347, %5 : vector<2x32xf32>
    %349 = arith.mulf %344, %348 : vector<2x32xf32>
    %350 = arith.addf %346, %349 : vector<2x32xf32>
    %351 = math.tanh %350 : vector<2x32xf32>
    %cst_69 = arith.constant 1.000000e+00 : f32
    %352 = vector.broadcast %cst_69 : f32 to vector<2x32xf32>
    %353 = arith.subf %352, %345 : vector<2x32xf32>
    %354 = arith.mulf %353, %351 : vector<2x32xf32>
    %355 = arith.mulf %345, %312 : vector<2x32xf32>
    %356 = arith.addf %354, %355 : vector<2x32xf32>
    %cst_70 = arith.constant dense<0.000000e+00> : vector<2x128xf32>
    %357 = tpu.matmul %356, %1, %cst_70 {dimension_numbers = #tpu.dot_dimension_numbers<[1], [0], [0], [1], [0, 0, 1, 1], [], []>} : vector<2x32xf32>, vector<32x128xf32>, vector<2x128xf32> -> vector<2x128xf32>
    %358 = arith.addf %357, %334 : vector<2x128xf32>
    %359 = vector.extract_strided_slice %358 {offsets = [0, 0], sizes = [2, 64], strides = [1, 1]} : vector<2x128xf32> to vector<2x64xf32>
    %360 = arith.negf %359 : vector<2x64xf32>
    %361 = math.exp %360 : vector<2x64xf32>
    %cst_71 = arith.constant 1.000000e+00 : f32
    %362 = vector.broadcast %cst_71 : f32 to vector<2x64xf32>
    %363 = arith.addf %362, %361 : vector<2x64xf32>
    %364 = arith.divf %362, %363 : vector<2x64xf32>
    %365 = vector.extract_strided_slice %364 {offsets = [0, 0], sizes = [2, 32], strides = [1, 1]} : vector<2x64xf32> to vector<2x32xf32>
    %366 = vector.extract_strided_slice %364 {offsets = [0, 32], sizes = [2, 32], strides = [1, 1]} : vector<2x64xf32> to vector<2x32xf32>
    %367 = vector.extract_strided_slice %358 {offsets = [0, 64], sizes = [2, 32], strides = [1, 1]} : vector<2x128xf32> to vector<2x32xf32>
    %368 = vector.extract_strided_slice %358 {offsets = [0, 96], sizes = [2, 32], strides = [1, 1]} : vector<2x128xf32> to vector<2x32xf32>
    %369 = arith.mulf %365, %368 : vector<2x32xf32>
    %370 = arith.addf %367, %369 : vector<2x32xf32>
    %371 = math.tanh %370 : vector<2x32xf32>
    %cst_72 = arith.constant 1.000000e+00 : f32
    %372 = vector.broadcast %cst_72 : f32 to vector<2x32xf32>
    %373 = arith.subf %372, %366 : vector<2x32xf32>
    %374 = arith.mulf %373, %371 : vector<2x32xf32>
    %375 = arith.mulf %366, %332 : vector<2x32xf32>
    %376 = arith.addf %374, %375 : vector<2x32xf32>
    %c0_73 = arith.constant 0 : index
    %c0_74 = arith.constant 0 : index
    %377 = vector.load %arg8[%c0_73, %c0_74] : memref<32x32xf32, #tpu.memory_space<vmem>>, vector<32x32xf32>
    %c0_75 = arith.constant 0 : index
    %c0_76 = arith.constant 0 : index
    %378 = vector.load %arg9[%c0_75, %c0_76] : memref<1x32xf32, #tpu.memory_space<vmem>>, vector<1x32xf32>
    %379 = vector.shape_cast %378 : vector<1x32xf32> to vector<1x32xf32>
    %380 = vector.broadcast %379 : vector<1x32xf32> to vector<16x32xf32>
    %c0_77 = arith.constant 0 : index
    %c0_78 = arith.constant 0 : index
    %381 = vector.load %arg10[%c0_77, %c0_78] : memref<1x32xf32, #tpu.memory_space<vmem>>, vector<1x32xf32>
    %382 = vector.shape_cast %381 : vector<1x32xf32> to vector<1x32xf32>
    %383 = vector.broadcast %382 : vector<1x32xf32> to vector<16x32xf32>
    %384 = tpu.concatenate %68, %112, %156, %200, %244, %288, %332, %376 in 0 : vector<2x32xf32>, vector<2x32xf32>, vector<2x32xf32>, vector<2x32xf32>, vector<2x32xf32>, vector<2x32xf32>, vector<2x32xf32>, vector<2x32xf32> -> vector<16x32xf32>
    %cst_79 = arith.constant dense<0.000000e+00> : vector<16x32xf32>
    %385 = tpu.matmul %384, %377, %cst_79 {dimension_numbers = #tpu.dot_dimension_numbers<[1], [0], [0], [1], [0, 0, 1, 1], [], []>} : vector<16x32xf32>, vector<32x32xf32>, vector<16x32xf32> -> vector<16x32xf32>
    %386 = arith.addf %385, %380 : vector<16x32xf32>
    %387 = math.tanh %386 : vector<16x32xf32>
    %388 = arith.mulf %387, %383 : vector<16x32xf32>
    %cst_80 = arith.constant dense<0.000000e+00> : vector<16xf32>
    %389 = vector.multi_reduction <add>, %388, %cst_80 [1] : vector<16x32xf32> to vector<16xf32>
    %390 = vector.shape_cast %389 : vector<16xf32> to vector<16x1xf32>
    %391 = vector.extract_strided_slice %390 {offsets = [0, 0], sizes = [2, 1], strides = [1, 1]} : vector<16x1xf32> to vector<2x1xf32>
    %392 = vector.extract_strided_slice %390 {offsets = [2, 0], sizes = [2, 1], strides = [1, 1]} : vector<16x1xf32> to vector<2x1xf32>
    %393 = vector.extract_strided_slice %390 {offsets = [4, 0], sizes = [2, 1], strides = [1, 1]} : vector<16x1xf32> to vector<2x1xf32>
    %394 = vector.extract_strided_slice %390 {offsets = [6, 0], sizes = [2, 1], strides = [1, 1]} : vector<16x1xf32> to vector<2x1xf32>
    %395 = vector.extract_strided_slice %390 {offsets = [8, 0], sizes = [2, 1], strides = [1, 1]} : vector<16x1xf32> to vector<2x1xf32>
    %396 = vector.extract_strided_slice %390 {offsets = [10, 0], sizes = [2, 1], strides = [1, 1]} : vector<16x1xf32> to vector<2x1xf32>
    %397 = vector.extract_strided_slice %390 {offsets = [12, 0], sizes = [2, 1], strides = [1, 1]} : vector<16x1xf32> to vector<2x1xf32>
    %398 = vector.extract_strided_slice %390 {offsets = [14, 0], sizes = [2, 1], strides = [1, 1]} : vector<16x1xf32> to vector<2x1xf32>
    %399 = arith.maximumf %391, %392 : vector<2x1xf32>
    %400 = arith.maximumf %399, %393 : vector<2x1xf32>
    %401 = arith.maximumf %400, %394 : vector<2x1xf32>
    %402 = arith.maximumf %401, %395 : vector<2x1xf32>
    %403 = arith.maximumf %402, %396 : vector<2x1xf32>
    %404 = arith.maximumf %403, %397 : vector<2x1xf32>
    %405 = arith.maximumf %404, %398 : vector<2x1xf32>
    %406 = arith.subf %391, %405 : vector<2x1xf32>
    %407 = math.exp %406 : vector<2x1xf32>
    %408 = arith.subf %392, %405 : vector<2x1xf32>
    %409 = math.exp %408 : vector<2x1xf32>
    %410 = arith.subf %393, %405 : vector<2x1xf32>
    %411 = math.exp %410 : vector<2x1xf32>
    %412 = arith.subf %394, %405 : vector<2x1xf32>
    %413 = math.exp %412 : vector<2x1xf32>
    %414 = arith.subf %395, %405 : vector<2x1xf32>
    %415 = math.exp %414 : vector<2x1xf32>
    %416 = arith.subf %396, %405 : vector<2x1xf32>
    %417 = math.exp %416 : vector<2x1xf32>
    %418 = arith.subf %397, %405 : vector<2x1xf32>
    %419 = math.exp %418 : vector<2x1xf32>
    %420 = arith.subf %398, %405 : vector<2x1xf32>
    %421 = math.exp %420 : vector<2x1xf32>
    %422 = vector.broadcast %407 : vector<2x1xf32> to vector<2x32xf32>
    %423 = arith.mulf %422, %68 : vector<2x32xf32>
    %424 = arith.addf %407, %409 : vector<2x1xf32>
    %425 = vector.broadcast %409 : vector<2x1xf32> to vector<2x32xf32>
    %426 = arith.mulf %425, %112 : vector<2x32xf32>
    %427 = arith.addf %423, %426 : vector<2x32xf32>
    %428 = arith.addf %424, %411 : vector<2x1xf32>
    %429 = vector.broadcast %411 : vector<2x1xf32> to vector<2x32xf32>
    %430 = arith.mulf %429, %156 : vector<2x32xf32>
    %431 = arith.addf %427, %430 : vector<2x32xf32>
    %432 = arith.addf %428, %413 : vector<2x1xf32>
    %433 = vector.broadcast %413 : vector<2x1xf32> to vector<2x32xf32>
    %434 = arith.mulf %433, %200 : vector<2x32xf32>
    %435 = arith.addf %431, %434 : vector<2x32xf32>
    %436 = arith.addf %432, %415 : vector<2x1xf32>
    %437 = vector.broadcast %415 : vector<2x1xf32> to vector<2x32xf32>
    %438 = arith.mulf %437, %244 : vector<2x32xf32>
    %439 = arith.addf %435, %438 : vector<2x32xf32>
    %440 = arith.addf %436, %417 : vector<2x1xf32>
    %441 = vector.broadcast %417 : vector<2x1xf32> to vector<2x32xf32>
    %442 = arith.mulf %441, %288 : vector<2x32xf32>
    %443 = arith.addf %439, %442 : vector<2x32xf32>
    %444 = arith.addf %440, %419 : vector<2x1xf32>
    %445 = vector.broadcast %419 : vector<2x1xf32> to vector<2x32xf32>
    %446 = arith.mulf %445, %332 : vector<2x32xf32>
    %447 = arith.addf %443, %446 : vector<2x32xf32>
    %448 = arith.addf %444, %421 : vector<2x1xf32>
    %449 = vector.broadcast %421 : vector<2x1xf32> to vector<2x32xf32>
    %450 = arith.mulf %449, %376 : vector<2x32xf32>
    %451 = arith.addf %447, %450 : vector<2x32xf32>
    %452 = tpu.reciprocal %448 {approx = true} : vector<2x1xf32> -> vector<2x1xf32>
    %453 = vector.broadcast %452 : vector<2x1xf32> to vector<2x32xf32>
    %454 = arith.mulf %451, %453 : vector<2x32xf32>
    %c0_81 = arith.constant 0 : index
    %c0_82 = arith.constant 0 : index
    %455 = vector.load %arg11[%c0_81, %c0_82] : memref<32x2xf32, #tpu.memory_space<vmem>>, vector<32x2xf32>
    %cst_83 = arith.constant dense<0.000000e+00> : vector<2x2xf32>
    %456 = tpu.matmul %454, %455, %cst_83 {dimension_numbers = #tpu.dot_dimension_numbers<[1], [0], [0], [1], [0, 0, 1, 1], [], []>} : vector<2x32xf32>, vector<32x2xf32>, vector<2x2xf32> -> vector<2x2xf32>
    %c0_84 = arith.constant 0 : index
    %c0_85 = arith.constant 0 : index
    %457 = vector.load %arg12[%c0_84, %c0_85] : memref<1x2xf32, #tpu.memory_space<vmem>>, vector<1x2xf32>
    %458 = vector.broadcast %457 : vector<1x2xf32> to vector<2x2xf32>
    %459 = arith.addf %456, %458 : vector<2x2xf32>
    %c0_86 = arith.constant 0 : index
    %c0_87 = arith.constant 0 : index
    %460 = vector.load %arg13[%c0_86, %c0_87] : memref<2x2xf32, #tpu.memory_space<vmem>>, vector<2x2xf32>
    tpu.vector_store %arg13[%c0_86, %c0_87], %459 {strides = array<i32>} : memref<2x2xf32, #tpu.memory_space<vmem>>, vector<2x2xf32>,
    return
  }
}

</mosaic_0001>

<bundles_post_ra>
// kernel: atten_gru_forward.1
= control target key start
LH: loop header
LB: loop body
LE: loop exit
PB: predicated region body
PF: predicated region fallthrough
CT: control target
= control target key end

     0   :  { %vm80_vm0 = vcmask 130048   ;;  %v3581_v3 = vmov 0.0|0.0   ;;  %vm3582_vm1 = vmmov 0   ;;  %v3583_v4 = vmov 0.0   ;;  %s3584_s19 = smov 64   ;;  %s3586_s24 = smov 32   ;;  %s4154_s1 = inlined_call_operand.vmem [shape: f32[16,96], index: 1, kind: input, shape index: {}]   ;;  %s4155_s0 = inlined_call_operand.vmem [shape: f32[16,16], index: 0, kind: input, shape index: {}]   ;;  %s4156_s3 = inlined_call_operand.vmem [shape: f32[32,96], index: 3, kind: input, shape index: {}]   ;;  %s4157_s4 = inlined_call_operand.vmem [shape: f32[1,32], index: 4, kind: input, shape index: {}]   ;;  %s4158_s2 = inlined_call_operand.vmem [shape: f32[1,96], index: 2, kind: input, shape index: {}]   ;;  %s4159_s6 = inlined_call_operand.vmem [shape: f32[32,128], index: 6, kind: input, shape index: {}]   ;;  %s4160_s5 = inlined_call_operand.vmem [shape: f32[32,128], index: 5, kind: input, shape index: {}]   ;;  %s4161_s7 = inlined_call_operand.vmem [shape: f32[1,128], index: 7, kind: input, shape index: {}]   ;;  %s4162_s8 = inlined_call_operand.vmem [shape: f32[32,32], index: 8, kind: input, shape index: {}]   ;;  %s4163_s9 = inlined_call_operand.vmem [shape: f32[1,32], index: 9, kind: input, shape index: {}]   ;;  %s4164_s10 = inlined_call_operand.vmem [shape: f32[1,32], index: 10, kind: input, shape index: {}]   ;;  %s4165_s11 = inlined_call_operand.vmem [shape: f32[32,2], index: 11, kind: input, shape index: {}]   ;;  %s4166_s12 = inlined_call_operand.vmem [shape: f32[1,2], index: 12, kind: input, shape index: {}]   ;;  %s4167_s13 = inlined_call_operand.vmem [shape: f32[2,2], index: 13, kind: output, shape index: {}]  }
   0x1   :  { %v71_v0 = vld [vmem:[%s4154_s1] sm:$0xff]  ;;  %v72_v1 = vld [vmem:[%s4154_s1 + $0x8] sm:$0xff]  ;;  %3272 = vmatprep.subr.bf16.mxu1 %v3581_v3  ;;  %2990 = vmatprep.mubr.msk.f32.mxu1 %vm3582_vm1, %v3583_v4  ;;  %v46_v11 = vld [vmem:[%s4156_s3 + $0x10] sm:$0xff]  ;;  %vm162_vm2 = vcmask 261120   ;;  %vm2414_vm3 = vcmask 1041408   ;;  %vm2416_vm4 = vcmask 1043456  }
   0x2   :  { %v69_v2 = vld [vmem:[%s4155_s0] sm:$0xff]  ;;  %v3268_v5 = vpack.c.bf16 %v72_v1, %v71_v0  ;;  %v45_v7 = vld [vmem:[%s4156_s3 + $0x8] sm:$0xff]  ;;  %v47_v12 = vld [vmem:[%s4156_s3 + $0x18] sm:$0xff]  ;;  %vm2418_vm5 = vcmask 1045504   ;;  %vm2785_vm6 = vcmask 9216  }
   0x3   :  { %2979 = vmatprep.mubr.msk.f32.mxu0 %vm80_vm0, %v69_v2  ;;  %v44_v6 = vld [vmem:[%s4156_s3] sm:$0xff]  ;;  %v70_v9 = vld [vmem:[%s4155_s0 + $0x8] sm:$0xff]  ;;  %v3695_v13 = vpack.c.bf16 %v47_v12, %v46_v11  ;;  %v54_v34 = vld [vmem:[%s4159_s6 + $0x10] sm:$0xff] }
   0x4   :  { %v2791_v8 = vld [vmem:[%s4157_s4] ss:$0 sm:$0xff]  ;;  %3269 = vmatprep.subr.bf16.mxu0 %v3268_v5  ;;  %v3684_v10 = vpack.c.bf16 %v45_v7, %v44_v6  ;;  %v53_v33 = vld [vmem:[%s4159_s6 + $0x8] sm:$0xff]  ;;  %v55_v36 = vld [vmem:[%s4159_s6 + $0x18] sm:$0xff] }
   0x5   :  { %313 = vrot.lane.b32.xlu0 %v2791_v8, %s3584_s19  ;;  %3271 = vmatpush3.bf16.msra.mxu0 %v3268_v5  ;;  %v2793_v14 = vld [vmem:[%s4158_s2] ss:$0 sm:$0xff]  ;;  %v3734_v37 = vpack.c.bf16 %v55_v36, %v54_v34  ;;  %v49_v39 = vld [vmem:[%s4160_s5 + $0x8] sm:$0xff]  ;;  %v50_v42 = vld [vmem:[%s4160_s5 + $0x10] sm:$0xff] }
   0x6   :  { %3278 = vmatprep.subr.bf16.mxu0 %v3581_v3  ;;  %v52_v32 = vld [vmem:[%s4159_s6] sm:$0xff]  ;;  %s3585_s6 = smov 96   ;;  %v51_v43 = vld [vmem:[%s4160_s5 + $0x18] sm:$0xff] }
   0x7   :  { %v3728_v35 = vpack.c.bf16 %v53_v33, %v52_v32  ;;  %v48_v38 = vld [vmem:[%s4160_s5] sm:$0xff]  ;;  %v3760_v44 = vpack.c.bf16 %v51_v43, %v50_v42 }
   0x8   :  { %2980 = vmatmul.mubr.msk.f32.vlgmr.msra.gmra.mrb[0].mxu0 %vm80_vm0, %v70_v9  ;;  %v3746_v41 = vpack.c.bf16 %v49_v39, %v48_v38  ;;  %v3788_v51 = vld [vmem:[%s4161_s7] ss:$0 sm:$0xff] }
   0x9   :  { %3280 = vmatpush3.bf16.msra.mxu0 %v3684_v10  ;;  %3001 = vmatprep.mubr.msk.f32.mxu0 %vm3582_vm1, %v3583_v4 }
   0xa   :  { %3281 = vmatprep.subr.bf16.mxu0 %v3581_v3  ;;  %3274 = vmatpush3.bf16.msra.mxu1 %v3728_v35 }
   0xb   :  { %3275 = vmatprep.subr.bf16.mxu1 %v3581_v3 }
   0xd   :  { %3283 = vmatpush3.bf16.msra.mxu0 %v3695_v13 }
   0xe   :  { %3290 = vmatprep.subr.bf16.mxu0 %v3581_v3  ;;  %3277 = vmatpush3.bf16.msra.mxu1 %v3734_v37 }
   0xf   :  { %3284 = vmatprep.subr.bf16.mxu1 %v3581_v3 }
  0x10   :  { %3002 = vmatmul.mubr.f32.vlgmr.msra.gmra.mrb[2].mxu0 %v3583_v4 }
  0x11   :  { %3023 = vmatprep.mubr.msk.f32.mxu0 %vm3582_vm1, %v3583_v4  ;;  %3292 = vmatpush3.bf16.msra.mxu0 %v3728_v35 }
  0x12   :  { %3293 = vmatprep.subr.bf16.mxu0 %v3581_v3  ;;  %2991 = vmatmul.mubr.f32.vlgmr.msra.gmra.mrb[0].mxu1 %v3583_v4 }
  0x13   :  { %3286 = vmatpush3.bf16.msra.mxu1 %v3746_v41  ;;  %3012 = vmatprep.mubr.msk.f32.mxu1 %vm3582_vm1, %v3583_v4 }
  0x14   :  { %3287 = vmatprep.subr.bf16.mxu1 %v3581_v3 }
  0x15   :  { %3295 = vmatpush3.bf16.msra.mxu0 %v3734_v37 }
  0x16   :  { %3302 = vmatprep.subr.bf16.mxu0 %v3581_v3 }
  0x17   :  { %3289 = vmatpush3.bf16.msra.mxu1 %v3760_v44 }
  0x18   :  { %3296 = vmatprep.subr.bf16.mxu1 %v3581_v3 }
  0x77   :  { %v3710_v18 = vpop.permute.xlu0 %313 }
  0xdb   :  { %v2981_v15 = vpop.f32.mrb[0].mxu0 }
  0xdc   :  { %v3708_v16 = vadd.f32 %v2981_v15, %v2793_v14  ;;  %v153_v17 = vpop.f32.mrb[1].mxu0 }
  0xdd   :  { %v3714_v22 = vadd.f32 %v2793_v14, %v153_v17 }
  0xe3   :  { %v302_v19 = vpop.f32.mrb[2].mxu0 }
  0xe4   :  { %v316_v20 = vadd.f32 %v3710_v18, %v302_v19  ;;  %v3003_v21 = vpop.f32.mrb[3].mxu0  ;;  %v306_v23 = vadd.f32 %v302_v19, %v3714_v22 }
  0xe6   :  { %318 = vrot.lane.b32.xlu0 %v316_v20, %s3584_s19  ;;  %v2796_v24 = vmul.f32 -1.442695, %v306_v23 }
  0xe8   :  { %3463 = vpow2.f32 %v2796_v24 }
  0xf2   :  { %v3464_v25 = vpop.eup %3463 }
  0xf3   :  { %v310_v26 = vadd.f32 1.0, %v3464_v25 }
  0xf5   :  { %3465 = vrcp.f32 %v310_v26 }
  0xff   :  { %v3466_v27 = vpop.eup %3465 }
 0x100   :  { %v328_v45 = vsub.f32 1.0, %v3466_v27  ;;  %v334_v47 = vmul.f32 0.0, %v3466_v27 }
 0x158   :  { %v319_v28 = vpop.permute.xlu0 %318 }
 0x159   :  { %v321_v29 = vmul.f32 %v3466_v27, %v319_v28 }
 0x15b   :  { %323 = vrot.lane.b32.xlu1 %v321_v29, %s3584_s19 }
 0x1cd   :  { %v324_v30 = vpop.permute.xlu1 %323 }
 0x1ce   :  { %v326_v31 = vadd.f32 %v324_v30, %v3714_v22 }
 0x1d0   :  { %3467 = vtanh.f32 %v326_v31 }
 0x1da   :  { %v3468_v40 = vpop.eup %3467 }
 0x1db   :  { %330 = vrot.lane.b32.xlu1 %v3468_v40, %s3585_s6 }
 0x24d   :  { %v331_v46 = vpop.permute.xlu1 %330 }
 0x24e   :  { %v333_v48 = vmul.f32 %v331_v46, %v328_v45 }
 0x250   :  { %v3767_v49 = vadd.f32 %v334_v47, %v333_v48 }
 0x252   :  { %337 = vrot.lane.b32.xlu0 %v3767_v49, %s3585_s6  ;;  %v610_v27 = vrot.slane %v3767_v49, 6 }
 0x2c4   :  { %v338_v50 = vpop.permute.xlu0 %337 }
 0x2c5   :  { %3013 = vmatmul.mubr.msk.f32.vlgmr.msra.gmra.mrb[0].mxu1 %vm162_vm2, %v338_v50 }
 0x2c6   :  { %3298 = vmatpush3.bf16.msra.mxu1 %v3684_v10  ;;  %3034 = vmatprep.mubr.msk.f32.mxu1 %vm3582_vm1, %v3583_v4 }
 0x2c7   :  { %3299 = vmatprep.subr.bf16.mxu1 %v3581_v3 }
 0x2ca   :  { %3301 = vmatpush3.bf16.msra.mxu1 %v3695_v13 }
 0x2cb   :  { %3308 = vmatprep.subr.bf16.mxu1 %v3581_v3 }
 0x2cd   :  { %3035 = vmatmul.mubr.msk.f32.vlgmr.msra.gmra.mrb[2].mxu1 %vm162_vm2, %v338_v50 }
 0x2ce   :  { %3310 = vmatpush3.bf16.msra.mxu1 %v3728_v35  ;;  %3056 = vmatprep.mubr.msk.f32.mxu1 %vm3582_vm1, %v3583_v4 }
 0x2cf   :  { %3311 = vmatprep.subr.bf16.mxu1 %v3581_v3 }
 0x2d2   :  { %3313 = vmatpush3.bf16.msra.mxu1 %v3734_v37 }
 0x2d3   :  { %3320 = vmatprep.subr.bf16.mxu1 %v3581_v3 }
 0x398   :  { %v407_v52 = vpop.f32.mrb[0].mxu1 }
 0x399   :  { %v3430_v53 = vadd.f32 %v3788_v51, %v407_v52  ;;  %v3014_v54 = vpop.f32.mrb[1].mxu1 }
 0x39b   :  { %418 = vrot.lane.b32.xlu1 %v3430_v53, %s3586_s24  ;;  %v2798_v59 = vmul.f32 -1.442695, %v3430_v53 }
 0x39d   :  { %3469 = vpow2.f32 %v2798_v59 }
 0x3a0   :  { %v577_v55 = vpop.f32.mrb[2].mxu1 }
 0x3a1   :  { %v591_v56 = vadd.f32 %v577_v55, %v3710_v18  ;;  %v3036_v57 = vpop.f32.mrb[3].mxu1  ;;  %v582_v60 = vrot.slane %v577_v55, 6 }
 0x3a3   :  { %v593_v58 = vrot.slane %v591_v56, 6  ;;  %v584_v61 = vadd.f32 %v582_v60, %v3714_v22 }
 0x3a5   :  { %594 = vrot.lane.b32.xlu0 %v593_v58, %s3584_s19  ;;  %v2801_v62 = vmul.f32 -1.442695, %v584_v61 }
 0x3a7   :  { %v3470_v63 = vpop.eup %3469  ;;  %3471 = vpow2.f32 %v2801_v62 }
 0x3a8   :  { %v414_v0 = vadd.f32 1.0, %v3470_v63 }
 0x3aa   :  { %3473 = vrcp.f32 %v414_v0 }
 0x3b1   :  { %v3472_v1 = vpop.eup %3471 }
 0x3b2   :  { %v588_v2 = vadd.f32 1.0, %v3472_v1 }
 0x3b4   :  { %v3474_v5 = vpop.eup %3473  ;;  %3475 = vrcp.f32 %v588_v2 }
 0x3b5   :  { %v428_v21 = vsub.f32 1.0, %v3474_v5  ;;  %v434_v24 = vmul.f32 0.0, %v3474_v5 }
 0x3be   :  { %v3476_v8 = vpop.eup %3475 }
 0x3bf   :  { %v604_v28 = vsub.f32 1.0, %v3476_v8  ;;  %v612_v31 = vmul.f32 %v3476_v8, %v610_v27 }
 0x40d   :  { %v419_v6 = vpop.permute.xlu1 %418 }
 0x40e   :  { %v421_v7 = vmul.f32 %v3474_v5, %v419_v6 }
 0x410   :  { %423 = vrot.lane.b32.xlu1 %v421_v7, %s3584_s19 }
 0x417   :  { %v595_v9 = vpop.permute.xlu0 %594 }
 0x418   :  { %v597_v11 = vmul.f32 %v3476_v8, %v595_v9 }
 0x41a   :  { %599 = vrot.lane.b32.xlu0 %v597_v11, %s3584_s19 }
 0x482   :  { %v424_v12 = vpop.permute.xlu1 %423 }
 0x483   :  { %v426_v14 = vadd.f32 %v3430_v53, %v424_v12 }
 0x485   :  { %3477 = vtanh.f32 %v426_v14 }
 0x48c   :  { %v600_v15 = vpop.permute.xlu0 %599 }
 0x48d   :  { %v602_v17 = vadd.f32 %v600_v15, %v3714_v22 }
 0x48f   :  { %v3478_v19 = vpop.eup %3477  ;;  %3479 = vtanh.f32 %v602_v17 }
 0x490   :  { %430 = vrot.lane.b32.xlu1 %v3478_v19, %s3585_s6 }
 0x499   :  { %v3480_v20 = vpop.eup %3479 }
 0x49a   :  { %606 = vrot.lane.b32.xlu0 %v3480_v20, %s3585_s6 }
 0x502   :  { %v431_v23 = vpop.permute.xlu1 %430 }
 0x503   :  { %v433_v25 = vmul.f32 %v431_v23, %v428_v21 }
 0x505   :  { %v3800_v26 = vadd.f32 %v434_v24, %v433_v25 }
 0x507   :  { %437 = vrot.lane.b32.xlu1 %v3800_v26, %s3585_s6 }
 0x50c   :  { %v607_v29 = vpop.permute.xlu0 %606 }
 0x50d   :  { %v609_v30 = vmul.f32 %v607_v29, %v604_v28 }
 0x50f   :  { %v3805_v32 = vadd.f32 %v612_v31, %v609_v30 }
 0x511   :  { %v615_v33 = vrot.slane %v3805_v32, 2  ;;  %v889_v12 = vrot.slane %v3805_v32, 6 }
 0x513   :  { %616 = vrot.lane.b32.xlu0 %v615_v33, %s3585_s6 }
 0x579   :  { %v438_v34 = vpop.permute.xlu1 %437 }
 0x57a   :  { %3024 = vmatmul.mubr.msk.f32.vlgmr.msra.gmra.mrb[4].mxu0 %vm162_vm2, %v438_v34 }
 0x57b   :  { %3304 = vmatpush3.bf16.msra.mxu0 %v3746_v41  ;;  %3045 = vmatprep.mubr.msk.f32.mxu0 %vm3582_vm1, %v3583_v4 }
 0x57c   :  { %3305 = vmatprep.subr.bf16.mxu0 %v3581_v3 }
 0x57f   :  { %3307 = vmatpush3.bf16.msra.mxu0 %v3760_v44 }
 0x580   :  { %3314 = vmatprep.subr.bf16.mxu0 %v3581_v3 }
 0x585   :  { %v617_v36 = vpop.permute.xlu0 %616 }
 0x586   :  { %3046 = vmatmul.mubr.msk.f32.vlgmr.msra.gmra.mrb[4].mxu0 %vm162_vm2, %v617_v36 }
 0x587   :  { %3316 = vmatpush3.bf16.msra.mxu0 %v3684_v10  ;;  %3067 = vmatprep.mubr.msk.f32.mxu0 %vm3582_vm1, %v3583_v4 }
 0x588   :  { %3317 = vmatprep.subr.bf16.mxu0 %v3581_v3 }
 0x58b   :  { %3319 = vmatpush3.bf16.msra.mxu0 %v3695_v13 }
 0x58c   :  { %3326 = vmatprep.subr.bf16.mxu0 %v3581_v3 }
 0x58e   :  { %3068 = vmatmul.mubr.msk.f32.vlgmr.msra.gmra.mrb[6].mxu0 %vm162_vm2, %v617_v36 }
 0x58f   :  { %3328 = vmatpush3.bf16.msra.mxu0 %v3728_v35  ;;  %3089 = vmatprep.mubr.msk.f32.mxu0 %vm3582_vm1, %v3583_v4 }
 0x590   :  { %3329 = vmatprep.subr.bf16.mxu0 %v3581_v3 }
 0x593   :  { %3331 = vmatpush3.bf16.msra.mxu0 %v3734_v37 }
 0x594   :  { %3338 = vmatprep.subr.bf16.mxu0 %v3581_v3 }
 0x659   :  { %v686_v38 = vpop.f32.mrb[4].mxu0 }
 0x65a   :  { %v3431_v39 = vadd.f32 %v3788_v51, %v686_v38  ;;  %v3047_v40 = vpop.f32.mrb[5].mxu0 }
 0x65c   :  { %697 = vrot.lane.b32.xlu1 %v3431_v39, %s3586_s24  ;;  %v2803_v47 = vmul.f32 -1.442695, %v3431_v39 }
 0x65e   :  { %3481 = vpow2.f32 %v2803_v47 }
 0x661   :  { %v856_v42 = vpop.f32.mrb[6].mxu0 }
 0x662   :  { %v870_v43 = vadd.f32 %v856_v42, %v3710_v18  ;;  %v3069_v45 = vpop.f32.mrb[7].mxu0  ;;  %v861_v48 = vrot.slane %v856_v42, 4 }
 0x664   :  { %v872_v46 = vrot.slane %v870_v43, 4  ;;  %v863_v49 = vadd.f32 %v861_v48, %v3714_v22 }
 0x666   :  { %873 = vrot.lane.b32.xlu0 %v872_v46, %s3584_s19  ;;  %v2806_v50 = vmul.f32 -1.442695, %v863_v49 }
 0x668   :  { %v3482_v52 = vpop.eup %3481  ;;  %3483 = vpow2.f32 %v2806_v50 }
 0x669   :  { %v693_v53 = vadd.f32 1.0, %v3482_v52 }
 0x66b   :  { %3485 = vrcp.f32 %v693_v53 }
 0x672   :  { %v3484_v54 = vpop.eup %3483 }
 0x673   :  { %v867_v55 = vadd.f32 1.0, %v3484_v54 }
 0x675   :  { %v3486_v56 = vpop.eup %3485  ;;  %3487 = vrcp.f32 %v867_v55 }
 0x676   :  { %v707_v6 = vsub.f32 1.0, %v3486_v56  ;;  %v713_v8 = vmul.f32 %v3486_v56, %v3800_v26 }
 0x67f   :  { %v3488_v59 = vpop.eup %3487 }
 0x680   :  { %v883_v14 = vsub.f32 1.0, %v3488_v59  ;;  %v891_v17 = vmul.f32 %v3488_v59, %v889_v12 }
 0x6ce   :  { %v698_v57 = vpop.permute.xlu1 %697 }
 0x6cf   :  { %v700_v58 = vmul.f32 %v3486_v56, %v698_v57 }
 0x6d1   :  { %702 = vrot.lane.b32.xlu1 %v700_v58, %s3584_s19 }
 0x6d8   :  { %v874_v60 = vpop.permute.xlu0 %873 }
 0x6d9   :  { %v876_v61 = vmul.f32 %v3488_v59, %v874_v60 }
 0x6db   :  { %878 = vrot.lane.b32.xlu0 %v876_v61, %s3584_s19 }
 0x743   :  { %v703_v62 = vpop.permute.xlu1 %702 }
 0x744   :  { %v705_v63 = vadd.f32 %v3431_v39, %v703_v62 }
 0x746   :  { %3489 = vtanh.f32 %v705_v63 }
 0x74d   :  { %v879_v0 = vpop.permute.xlu0 %878 }
 0x74e   :  { %v881_v1 = vadd.f32 %v879_v0, %v3714_v22 }
 0x750   :  { %v3490_v2 = vpop.eup %3489  ;;  %3491 = vtanh.f32 %v881_v1 }
 0x751   :  { %709 = vrot.lane.b32.xlu1 %v3490_v2, %s3585_s6 }
 0x75a   :  { %v3492_v5 = vpop.eup %3491 }
 0x75b   :  { %885 = vrot.lane.b32.xlu0 %v3492_v5, %s3585_s6 }
 0x7c3   :  { %v710_v7 = vpop.permute.xlu1 %709 }
 0x7c4   :  { %v712_v9 = vmul.f32 %v710_v7, %v707_v6 }
 0x7c6   :  { %v3841_v11 = vadd.f32 %v713_v8, %v712_v9 }
 0x7c8   :  { %716 = vrot.lane.b32.xlu1 %v3841_v11, %s3585_s6 }
 0x7cd   :  { %v886_v15 = vpop.permute.xlu0 %885 }
 0x7ce   :  { %v888_v19 = vmul.f32 %v886_v15, %v883_v14 }
 0x7d0   :  { %v3846_v20 = vadd.f32 %v891_v17, %v888_v19 }
 0x7d2   :  { %v894_v21 = vrot.slane %v3846_v20, 4  ;;  %v1168_v63 = vrot.slane %v3846_v20, 6 }
 0x7d4   :  { %895 = vrot.lane.b32.xlu0 %v894_v21, %s3585_s6 }
 0x83a   :  { %v717_v23 = vpop.permute.xlu1 %716 }
 0x83b   :  { %3057 = vmatmul.mubr.msk.f32.vlgmr.msra.gmra.mrb[4].mxu1 %vm162_vm2, %v717_v23 }
 0x83c   :  { %3322 = vmatpush3.bf16.msra.mxu1 %v3746_v41  ;;  %3078 = vmatprep.mubr.msk.f32.mxu1 %vm3582_vm1, %v3583_v4 }
 0x83d   :  { %3323 = vmatprep.subr.bf16.mxu1 %v3581_v3 }
 0x840   :  { %3325 = vmatpush3.bf16.msra.mxu1 %v3760_v44 }
 0x841   :  { %3332 = vmatprep.subr.bf16.mxu1 %v3581_v3 }
 0x846   :  { %v896_v24 = vpop.permute.xlu0 %895 }
 0x847   :  { %3079 = vmatmul.mubr.msk.f32.vlgmr.msra.gmra.mrb[4].mxu1 %vm162_vm2, %v896_v24 }
 0x848   :  { %3334 = vmatpush3.bf16.msra.mxu1 %v3684_v10  ;;  %3100 = vmatprep.mubr.msk.f32.mxu1 %vm3582_vm1, %v3583_v4 }
 0x849   :  { %3335 = vmatprep.subr.bf16.mxu1 %v3581_v3 }
 0x84c   :  { %3337 = vmatpush3.bf16.msra.mxu1 %v3695_v13 }
 0x84d   :  { %3344 = vmatprep.subr.bf16.mxu1 %v3581_v3 }
 0x84f   :  { %3101 = vmatmul.mubr.msk.f32.vlgmr.msra.gmra.mrb[6].mxu1 %vm162_vm2, %v896_v24 }
 0x850   :  { %3346 = vmatpush3.bf16.msra.mxu1 %v3728_v35  ;;  %3122 = vmatprep.mubr.msk.f32.mxu1 %vm3582_vm1, %v3583_v4 }
 0x851   :  { %3347 = vmatprep.subr.bf16.mxu1 %v3581_v3 }
 0x854   :  { %3349 = vmatpush3.bf16.msra.mxu1 %v3734_v37 }
 0x855   :  { %3356 = vmatprep.subr.bf16.mxu1 %v3581_v3 }
 0x91a   :  { %v965_v25 = vpop.f32.mrb[4].mxu1 }
 0x91b   :  { %v3432_v27 = vadd.f32 %v3788_v51, %v965_v25  ;;  %v3080_v28 = vpop.f32.mrb[5].mxu1 }
 0x91d   :  { %976 = vrot.lane.b32.xlu1 %v3432_v27, %s3586_s24  ;;  %v2808_v33 = vmul.f32 -1.442695, %v3432_v27 }
 0x91f   :  { %3493 = vpow2.f32 %v2808_v33 }
 0x922   :  { %v1135_v29 = vpop.f32.mrb[6].mxu1 }
 0x923   :  { %v1149_v30 = vadd.f32 %v1135_v29, %v3710_v18  ;;  %v3102_v31 = vpop.f32.mrb[7].mxu1  ;;  %v1140_v34 = vrot.slane %v1135_v29, 2 }
 0x925   :  { %v1151_v32 = vrot.slane %v1149_v30, 2  ;;  %v1142_v36 = vadd.f32 %v1140_v34, %v3714_v22 }
 0x927   :  { %1152 = vrot.lane.b32.xlu0 %v1151_v32, %s3584_s19  ;;  %v2811_v38 = vmul.f32 -1.442695, %v1142_v36 }
 0x929   :  { %v3494_v39 = vpop.eup %3493  ;;  %3495 = vpow2.f32 %v2811_v38 }
 0x92a   :  { %v972_v40 = vadd.f32 1.0, %v3494_v39 }
 0x92c   :  { %3497 = vrcp.f32 %v972_v40 }
 0x933   :  { %v3496_v42 = vpop.eup %3495 }
 0x934   :  { %v1146_v43 = vadd.f32 1.0, %v3496_v42 }
 0x936   :  { %v3498_v45 = vpop.eup %3497  ;;  %3499 = vrcp.f32 %v1146_v43 }
 0x937   :  { %v986_v58 = vsub.f32 1.0, %v3498_v45  ;;  %v992_v60 = vmul.f32 %v3498_v45, %v3841_v11 }
 0x940   :  { %v3500_v48 = vpop.eup %3499 }
 0x941   :  { %v1170_v1 = vmul.f32 %v3500_v48, %v1168_v63 }
 0x98f   :  { %v977_v46 = vpop.permute.xlu1 %976 }
 0x990   :  { %v979_v47 = vmul.f32 %v3498_v45, %v977_v46 }
 0x992   :  { %981 = vrot.lane.b32.xlu1 %v979_v47, %s3584_s19 }
 0x999   :  { %v1153_v49 = vpop.permute.xlu0 %1152 }
 0x99a   :  { %v1155_v50 = vmul.f32 %v3500_v48, %v1153_v49 }
 0x99c   :  { %1157 = vrot.lane.b32.xlu0 %v1155_v50, %s3584_s19 }
 0xa04   :  { %v982_v52 = vpop.permute.xlu1 %981 }
 0xa05   :  { %v984_v53 = vadd.f32 %v3432_v27, %v982_v52 }
 0xa07   :  { %3501 = vtanh.f32 %v984_v53 }
 0xa0e   :  { %v1158_v54 = vpop.permute.xlu0 %1157 }
 0xa0f   :  { %v1160_v55 = vadd.f32 %v1158_v54, %v3714_v22  ;;  %v1162_v22 = vsub.f32 1.0, %v3500_v48 }
 0xa11   :  { %v3502_v56 = vpop.eup %3501  ;;  %3503 = vtanh.f32 %v1160_v55 }
 0xa12   :  { %988 = vrot.lane.b32.xlu1 %v3502_v56, %s3585_s6 }
 0xa1b   :  { %v3504_v57 = vpop.eup %3503 }
 0xa1c   :  { %1164 = vrot.lane.b32.xlu0 %v3504_v57, %s3585_s6 }
 0xa84   :  { %v989_v59 = vpop.permute.xlu1 %988 }
 0xa85   :  { %v991_v61 = vmul.f32 %v989_v59, %v986_v58 }
 0xa87   :  { %v3882_v62 = vadd.f32 %v992_v60, %v991_v61 }
 0xa89   :  { %995 = vrot.lane.b32.xlu1 %v3882_v62, %s3585_s6 }
 0xa8e   :  { %v1165_v0 = vpop.permute.xlu0 %1164 }
 0xa8f   :  { %v1167_v2 = vmul.f32 %v1165_v0, %v1162_v22 }
 0xa91   :  { %v3887_v5 = vadd.f32 %v1170_v1, %v1167_v2 }
 0xa93   :  { %v1173_v6 = vrot.slane %v3887_v5, 6 }
 0xa95   :  { %1174 = vrot.lane.b32.xlu0 %v1173_v6, %s3585_s6 }
 0xafb   :  { %v996_v7 = vpop.permute.xlu1 %995 }
 0xafc   :  { %3090 = vmatmul.mubr.msk.f32.vlgmr.msra.gmra.mrb[8].mxu0 %vm162_vm2, %v996_v7 }
 0xafd   :  { %3340 = vmatpush3.bf16.msra.mxu0 %v3746_v41  ;;  %3111 = vmatprep.mubr.msk.f32.mxu0 %vm3582_vm1, %v3583_v4 }
 0xafe   :  { %3341 = vmatprep.subr.bf16.mxu0 %v3581_v3 }
 0xb01   :  { %3343 = vmatpush3.bf16.msra.mxu0 %v3760_v44 }
 0xb02   :  { %3350 = vmatprep.subr.bf16.mxu0 %v3581_v3 }
 0xb07   :  { %v1175_v8 = vpop.permute.xlu0 %1174 }
 0xb08   :  { %3112 = vmatmul.mubr.msk.f32.vlgmr.msra.gmra.mrb[8].mxu0 %vm162_vm2, %v1175_v8 }
 0xb09   :  { %3352 = vmatpush3.bf16.msra.mxu0 %v3684_v10  ;;  %3133 = vmatprep.mubr.msk.f32.mxu0 %vm3582_vm1, %v3583_v4 }
 0xb0a   :  { %3353 = vmatprep.subr.bf16.mxu0 %v3581_v3 }
 0xb0d   :  { %3355 = vmatpush3.bf16.msra.mxu0 %v3695_v13 }
 0xb0e   :  { %3362 = vmatprep.subr.bf16.mxu0 %v3581_v3 }
 0xb10   :  { %3134 = vmatmul.mubr.msk.f32.vlgmr.msra.gmra.mrb[10].mxu0 %vm162_vm2, %v1175_v8 }
 0xb11   :  { %3364 = vmatpush3.bf16.msra.mxu0 %v3728_v35  ;;  %3155 = vmatprep.mubr.msk.f32.mxu0 %vm3582_vm1, %v3583_v4 }
 0xb12   :  { %3365 = vmatprep.subr.bf16.mxu0 %v3581_v3 }
 0xb15   :  { %3367 = vmatpush3.bf16.msra.mxu0 %v3734_v37 }
 0xb16   :  { %3374 = vmatprep.subr.bf16.mxu0 %v3581_v3 }
 0xbdb   :  { %v1244_v9 = vpop.f32.mrb[8].mxu0 }
 0xbdc   :  { %v3433_v12 = vadd.f32 %v3788_v51, %v1244_v9  ;;  %v3113_v14 = vpop.f32.mrb[9].mxu0 }
 0xbde   :  { %1255 = vrot.lane.b32.xlu1 %v3433_v12, %s3586_s24  ;;  %v2813_v20 = vmul.f32 -1.442695, %v3433_v12 }
 0xbe0   :  { %3505 = vpow2.f32 %v2813_v20 }
 0xbe3   :  { %v1414_v15 = vpop.f32.mrb[10].mxu0 }
 0xbe4   :  { %v1425_v17 = vadd.f32 %v1414_v15, %v3710_v18  ;;  %v3135_v19 = vpop.f32.mrb[11].mxu0  ;;  %v1418_v21 = vadd.f32 %v1414_v15, %v3708_v16 }
 0xbe6   :  { %1427 = vrot.lane.b32.xlu0 %v1425_v17, %s3584_s19  ;;  %v2816_v23 = vmul.f32 -1.442695, %v1418_v21 }
 0xbe8   :  { %3507 = vpow2.f32 %v2816_v23 }
 0xbea   :  { %v3506_v24 = vpop.eup %3505 }
 0xbeb   :  { %v1251_v25 = vadd.f32 1.0, %v3506_v24 }
 0xbed   :  { %3509 = vrcp.f32 %v1251_v25 }
 0xbf2   :  { %v3508_v27 = vpop.eup %3507 }
 0xbf3   :  { %v1422_v28 = vadd.f32 1.0, %v3508_v27 }
 0xbf5   :  { %3511 = vrcp.f32 %v1422_v28 }
 0xbf7   :  { %v3510_v29 = vpop.eup %3509 }
 0xbf8   :  { %v1265_v45 = vsub.f32 1.0, %v3510_v29  ;;  %v1271_v47 = vmul.f32 %v3510_v29, %v3882_v62 }
 0xbff   :  { %v3512_v32 = vpop.eup %3511 }
 0xc00   :  { %v1437_v50 = vsub.f32 1.0, %v3512_v32  ;;  %v1444_v53 = vmul.f32 %v3512_v32, %v1173_v6 }
 0xc50   :  { %v1256_v30 = vpop.permute.xlu1 %1255 }
 0xc51   :  { %v1258_v31 = vmul.f32 %v3510_v29, %v1256_v30 }
 0xc53   :  { %1260 = vrot.lane.b32.xlu1 %v1258_v31, %s3584_s19 }
 0xc58   :  { %v1428_v33 = vpop.permute.xlu0 %1427 }
 0xc59   :  { %v1430_v34 = vmul.f32 %v3512_v32, %v1428_v33 }
 0xc5b   :  { %1432 = vrot.lane.b32.xlu0 %v1430_v34, %s3584_s19 }
 0xcc5   :  { %v1261_v36 = vpop.permute.xlu1 %1260 }
 0xcc6   :  { %v1263_v38 = vadd.f32 %v3433_v12, %v1261_v36 }
 0xcc8   :  { %3513 = vtanh.f32 %v1263_v38 }
 0xccd   :  { %v1433_v39 = vpop.permute.xlu0 %1432 }
 0xcce   :  { %v1435_v40 = vadd.f32 %v1433_v39, %v3708_v16 }
 0xcd0   :  { %3515 = vtanh.f32 %v1435_v40 }
 0xcd2   :  { %v3514_v42 = vpop.eup %3513 }
 0xcd3   :  { %1267 = vrot.lane.b32.xlu1 %v3514_v42, %s3585_s6 }
 0xcda   :  { %v3516_v43 = vpop.eup %3515 }
 0xcdb   :  { %1439 = vrot.lane.b32.xlu0 %v3516_v43, %s3585_s6 }
 0xd45   :  { %v1268_v46 = vpop.permute.xlu1 %1267 }
 0xd46   :  { %v1270_v48 = vmul.f32 %v1268_v46, %v1265_v45 }
 0xd48   :  { %v3925_v49 = vadd.f32 %v1271_v47, %v1270_v48 }
 0xd4a   :  { %1274 = vrot.lane.b32.xlu1 %v3925_v49, %s3585_s6 }
 0xd4d   :  { %v1440_v52 = vpop.permute.xlu0 %1439 }
 0xd4e   :  { %v1442_v54 = vmul.f32 %v1440_v52, %v1437_v50 }
 0xd50   :  { %v3931_v55 = vadd.f32 %v1444_v53, %v1442_v54 }
 0xd52   :  { %1447 = vrot.lane.b32.xlu0 %v3931_v55, %s3585_s6  ;;  %v1720_v36 = vrot.slane %v3931_v55, 6 }
 0xdbc   :  { %v1275_v56 = vpop.permute.xlu1 %1274 }
 0xdbd   :  { %3123 = vmatmul.mubr.msk.f32.vlgmr.msra.gmra.mrb[8].mxu1 %vm162_vm2, %v1275_v56 }
 0xdbe   :  { %3358 = vmatpush3.bf16.msra.mxu1 %v3746_v41  ;;  %3144 = vmatprep.mubr.msk.f32.mxu1 %vm3582_vm1, %v3583_v4 }
 0xdbf   :  { %3359 = vmatprep.subr.bf16.mxu1 %v3581_v3 }
 0xdc2   :  { %3361 = vmatpush3.bf16.msra.mxu1 %v3760_v44 }
 0xdc3   :  { %3368 = vmatprep.subr.bf16.mxu1 %v3581_v3 }
 0xdc4   :  { %v1448_v57 = vpop.permute.xlu0 %1447 }
 0xdc5   :  { %3145 = vmatmul.mubr.msk.f32.vlgmr.msra.gmra.mrb[8].mxu1 %vm162_vm2, %v1448_v57 }
 0xdc6   :  { %3370 = vmatpush3.bf16.msra.mxu1 %v3684_v10  ;;  %3166 = vmatprep.mubr.msk.f32.mxu1 %vm3582_vm1, %v3583_v4 }
 0xdc7   :  { %3371 = vmatprep.subr.bf16.mxu1 %v3581_v3 }
 0xdca   :  { %3373 = vmatpush3.bf16.msra.mxu1 %v3695_v13 }
 0xdcb   :  { %3380 = vmatprep.subr.bf16.mxu1 %v3581_v3 }
 0xdcd   :  { %3167 = vmatmul.mubr.msk.f32.vlgmr.msra.gmra.mrb[10].mxu1 %vm162_vm2, %v1448_v57 }
 0xdce   :  { %3382 = vmatpush3.bf16.msra.mxu1 %v3728_v35  ;;  %3188 = vmatprep.mubr.msk.f32.mxu1 %vm3582_vm1, %v3583_v4 }
 0xdcf   :  { %3383 = vmatprep.subr.bf16.mxu1 %v3581_v3 }
 0xdd2   :  { %3385 = vmatpush3.bf16.msra.mxu1 %v3734_v37 }
 0xdd3   :  { %3392 = vmatprep.subr.bf16.mxu1 %v3581_v3 }
 0xe98   :  { %v1517_v58 = vpop.f32.mrb[8].mxu1 }
 0xe99   :  { %v3434_v59 = vadd.f32 %v3788_v51, %v1517_v58  ;;  %v3146_v60 = vpop.f32.mrb[9].mxu1 }
 0xe9b   :  { %1528 = vrot.lane.b32.xlu1 %v3434_v59, %s3586_s24  ;;  %v2818_v1 = vmul.f32 -1.442695, %v3434_v59 }
 0xe9d   :  { %3517 = vpow2.f32 %v2818_v1 }
 0xea0   :  { %v1687_v61 = vpop.f32.mrb[10].mxu1 }
 0xea1   :  { %v1701_v63 = vadd.f32 %v1687_v61, %v3710_v18  ;;  %v3168_v22 = vpop.f32.mrb[11].mxu1  ;;  %v1692_v2 = vrot.slane %v1687_v61, 6 }
 0xea3   :  { %v1703_v0 = vrot.slane %v1701_v63, 6  ;;  %v1694_v5 = vadd.f32 %v1692_v2, %v3708_v16 }
 0xea5   :  { %1704 = vrot.lane.b32.xlu0 %v1703_v0, %s3584_s19  ;;  %v2821_v6 = vmul.f32 -1.442695, %v1694_v5 }
 0xea7   :  { %v3518_v7 = vpop.eup %3517  ;;  %3519 = vpow2.f32 %v2821_v6 }
 0xea8   :  { %v1524_v8 = vadd.f32 1.0, %v3518_v7 }
 0xeaa   :  { %3521 = vrcp.f32 %v1524_v8 }
 0xeb1   :  { %v3520_v9 = vpop.eup %3519 }
 0xeb2   :  { %v1698_v12 = vadd.f32 1.0, %v3520_v9 }
 0xeb4   :  { %v3522_v14 = vpop.eup %3521  ;;  %3523 = vrcp.f32 %v1698_v12 }
 0xeb5   :  { %v1538_v30 = vsub.f32 1.0, %v3522_v14  ;;  %v1544_v32 = vmul.f32 %v3522_v14, %v3925_v49 }
 0xebe   :  { %v3524_v19 = vpop.eup %3523 }
 0xebf   :  { %v1714_v38 = vsub.f32 1.0, %v3524_v19  ;;  %v1722_v42 = vmul.f32 %v3524_v19, %v1720_v36 }
 0xf0d   :  { %v1529_v15 = vpop.permute.xlu1 %1528 }
 0xf0e   :  { %v1531_v17 = vmul.f32 %v3522_v14, %v1529_v15 }
 0xf10   :  { %1533 = vrot.lane.b32.xlu1 %v1531_v17, %s3584_s19 }
 0xf17   :  { %v1705_v20 = vpop.permute.xlu0 %1704 }
 0xf18   :  { %v1707_v21 = vmul.f32 %v3524_v19, %v1705_v20 }
 0xf1a   :  { %1709 = vrot.lane.b32.xlu0 %v1707_v21, %s3584_s19 }
 0xf82   :  { %v1534_v23 = vpop.permute.xlu1 %1533 }
 0xf83   :  { %v1536_v24 = vadd.f32 %v3434_v59, %v1534_v23 }
 0xf85   :  { %3525 = vtanh.f32 %v1536_v24 }
 0xf8c   :  { %v1710_v25 = vpop.permute.xlu0 %1709 }
 0xf8d   :  { %v1712_v27 = vadd.f32 %v1710_v25, %v3708_v16 }
 0xf8f   :  { %v3526_v28 = vpop.eup %3525  ;;  %3527 = vtanh.f32 %v1712_v27 }
 0xf90   :  { %1540 = vrot.lane.b32.xlu1 %v3526_v28, %s3585_s6 }
 0xf99   :  { %v3528_v29 = vpop.eup %3527 }
 0xf9a   :  { %1716 = vrot.lane.b32.xlu0 %v3528_v29, %s3585_s6 }
0x1002   :  { %v1541_v31 = vpop.permute.xlu1 %1540 }
0x1003   :  { %v1543_v33 = vmul.f32 %v1541_v31, %v1538_v30 }
0x1005   :  { %v3967_v34 = vadd.f32 %v1544_v32, %v1543_v33 }
0x1007   :  { %1547 = vrot.lane.b32.xlu1 %v3967_v34, %s3585_s6 }
0x100c   :  { %v1717_v39 = vpop.permute.xlu0 %1716 }
0x100d   :  { %v1719_v40 = vmul.f32 %v1717_v39, %v1714_v38 }
0x100f   :  { %v3972_v43 = vadd.f32 %v1722_v42, %v1719_v40 }
0x1011   :  { %v1725_v45 = vrot.slane %v3972_v43, 2  ;;  %v1999_v24 = vrot.slane %v3972_v43, 6 }
0x1013   :  { %1726 = vrot.lane.b32.xlu0 %v1725_v45, %s3585_s6 }
0x1079   :  { %v1548_v46 = vpop.permute.xlu1 %1547 }
0x107a   :  { %3156 = vmatmul.mubr.msk.f32.vlgmr.msra.gmra.mrb[12].mxu0 %vm162_vm2, %v1548_v46 }
0x107b   :  { %3376 = vmatpush3.bf16.msra.mxu0 %v3746_v41  ;;  %3177 = vmatprep.mubr.msk.f32.mxu0 %vm3582_vm1, %v3583_v4 }
0x107c   :  { %3377 = vmatprep.subr.bf16.mxu0 %v3581_v3 }
0x107f   :  { %3379 = vmatpush3.bf16.msra.mxu0 %v3760_v44 }
0x1080   :  { %3386 = vmatprep.subr.bf16.mxu0 %v3581_v3 }
0x1085   :  { %v1727_v47 = vpop.permute.xlu0 %1726 }
0x1086   :  { %3178 = vmatmul.mubr.msk.f32.vlgmr.msra.gmra.mrb[12].mxu0 %vm162_vm2, %v1727_v47 }
0x1087   :  { %3388 = vmatpush3.bf16.msra.mxu0 %v3684_v10  ;;  %3199 = vmatprep.mubr.msk.f32.mxu0 %vm3582_vm1, %v3583_v4 }
0x1088   :  { %3389 = vmatprep.subr.bf16.mxu0 %v3581_v3 }
0x108b   :  { %3391 = vmatpush3.bf16.msra.mxu0 %v3695_v13 }
0x108c   :  { %3398 = vmatprep.subr.bf16.mxu0 %v3581_v3 }
0x108e   :  { %3200 = vmatmul.mubr.msk.f32.vlgmr.msra.gmra.mrb[14].mxu0 %vm162_vm2, %v1727_v47 }
0x108f   :  { %3400 = vmatpush3.bf16.msra.mxu0 %v3728_v35  ;;  %3221 = vmatprep.mubr.msk.f32.mxu0 %vm3582_vm1, %v3583_v4 }
0x1090   :  { %3401 = vmatprep.subr.bf16.mxu0 %v3581_v3 }
0x1093   :  { %3403 = vmatpush3.bf16.msra.mxu0 %v3734_v37 }
0x1094   :  { %3410 = vmatprep.subr.bf16.mxu0 %v3581_v3 }
0x1159   :  { %v1796_v48 = vpop.f32.mrb[12].mxu0 }
0x115a   :  { %v3435_v50 = vadd.f32 %v3788_v51, %v1796_v48  ;;  %v3179_v52 = vpop.f32.mrb[13].mxu0 }
0x115c   :  { %1807 = vrot.lane.b32.xlu1 %v3435_v50, %s3586_s24  ;;  %v2823_v56 = vmul.f32 -1.442695, %v3435_v50 }
0x115e   :  { %3529 = vpow2.f32 %v2823_v56 }
0x1161   :  { %v1966_v53 = vpop.f32.mrb[14].mxu0 }
0x1162   :  { %v1980_v54 = vadd.f32 %v1966_v53, %v3710_v18  ;;  %v3201_v55 = vpop.f32.mrb[15].mxu0  ;;  %v1971_v57 = vrot.slane %v1966_v53, 4 }
0x1164   :  { %v1982_v35 = vrot.slane %v1980_v54, 4  ;;  %v1973_v37 = vadd.f32 %v1971_v57, %v3708_v16 }
0x1166   :  { %1983 = vrot.lane.b32.xlu0 %v1982_v35, %s3584_s19  ;;  %v2826_v58 = vmul.f32 -1.442695, %v1973_v37 }
0x1168   :  { %v3530_v59 = vpop.eup %3529  ;;  %3531 = vpow2.f32 %v2826_v58 }
0x1169   :  { %v1803_v60 = vadd.f32 1.0, %v3530_v59 }
0x116b   :  { %3533 = vrcp.f32 %v1803_v60 }
0x1172   :  { %v3532_v61 = vpop.eup %3531 }
0x1173   :  { %v1977_v63 = vadd.f32 1.0, %v3532_v61 }
0x1175   :  { %v3534_v22 = vpop.eup %3533  ;;  %3535 = vrcp.f32 %v1977_v63 }
0x1176   :  { %v1817_v17 = vsub.f32 1.0, %v3534_v22  ;;  %v1823_v20 = vmul.f32 %v3534_v22, %v3967_v34 }
0x117f   :  { %v3536_v2 = vpop.eup %3535 }
0x1180   :  { %v1993_v25 = vsub.f32 1.0, %v3536_v2  ;;  %v2001_v28 = vmul.f32 %v3536_v2, %v1999_v24 }
0x11ce   :  { %v1808_v0 = vpop.permute.xlu1 %1807 }
0x11cf   :  { %v1810_v1 = vmul.f32 %v3534_v22, %v1808_v0 }
0x11d1   :  { %1812 = vrot.lane.b32.xlu1 %v1810_v1, %s3584_s19 }
0x11d8   :  { %v1984_v5 = vpop.permute.xlu0 %1983 }
0x11d9   :  { %v1986_v6 = vmul.f32 %v3536_v2, %v1984_v5 }
0x11db   :  { %1988 = vrot.lane.b32.xlu0 %v1986_v6, %s3584_s19 }
0x1243   :  { %v1813_v7 = vpop.permute.xlu1 %1812 }
0x1244   :  { %v1815_v8 = vadd.f32 %v3435_v50, %v1813_v7 }
0x1246   :  { %3537 = vtanh.f32 %v1815_v8 }
0x124d   :  { %v1989_v9 = vpop.permute.xlu0 %1988 }
0x124e   :  { %v1991_v12 = vadd.f32 %v1989_v9, %v3708_v16 }
0x1250   :  { %v3538_v14 = vpop.eup %3537  ;;  %3539 = vtanh.f32 %v1991_v12 }
0x1251   :  { %1819 = vrot.lane.b32.xlu1 %v3538_v14, %s3585_s6 }
0x125a   :  { %v3540_v15 = vpop.eup %3539 }
0x125b   :  { %1995 = vrot.lane.b32.xlu0 %v3540_v15, %s3585_s6 }
0x12c3   :  { %v1820_v19 = vpop.permute.xlu1 %1819 }
0x12c4   :  { %v1822_v21 = vmul.f32 %v1820_v19, %v1817_v17 }
0x12c6   :  { %v4008_v23 = vadd.f32 %v1823_v20, %v1822_v21 }
0x12c8   :  { %1826 = vrot.lane.b32.xlu1 %v4008_v23, %s3585_s6 }
0x12cd   :  { %v1996_v27 = vpop.permute.xlu0 %1995 }
0x12ce   :  { %v1998_v29 = vmul.f32 %v1996_v27, %v1993_v25  ;;  %v2401_v27 = vrot.slane %v3841_v11, 6 }
0x12d0   :  { %v4013_v30 = vadd.f32 %v2001_v28, %v1998_v29  ;;  %v2403_v29 = vrot.slane %v3882_v62, 4 }
0x12d2   :  { %v2004_v31 = vrot.slane %v4013_v30, 4  ;;  %v2278_v6 = vrot.slane %v4013_v30, 6 }
0x12d4   :  { %2005 = vrot.lane.b32.xlu0 %v2004_v31, %s3585_s6 }
0x133a   :  { %v1827_v32 = vpop.permute.xlu1 %1826 }
0x133b   :  { %3189 = vmatmul.mubr.msk.f32.vlgmr.msra.gmra.mrb[12].mxu1 %vm162_vm2, %v1827_v32 }
0x133c   :  { %3394 = vmatpush3.bf16.msra.mxu1 %v3746_v41  ;;  %3210 = vmatprep.mubr.msk.f32.mxu1 %vm3582_vm1, %v3583_v4 }
0x133d   :  { %3395 = vmatprep.subr.bf16.mxu1 %v3581_v3 }
0x1340   :  { %3397 = vmatpush3.bf16.msra.mxu1 %v3760_v44 }
0x1341   :  { %3404 = vmatprep.subr.bf16.mxu1 %v3581_v3 }
0x1346   :  { %v2006_v33 = vpop.permute.xlu0 %2005 }
0x1347   :  { %3211 = vmatmul.mubr.msk.f32.vlgmr.msra.gmra.mrb[12].mxu1 %vm162_vm2, %v2006_v33 }
0x1348   :  { %3406 = vmatpush3.bf16.msra.mxu1 %v3684_v10  ;;  %3232 = vmatprep.mubr.msk.f32.mxu1 %vm3582_vm1, %v3583_v4 }
0x1349   :  { %3407 = vmatprep.subr.bf16.mxu1 %v3581_v3 }
0x134c   :  { %3409 = vmatpush3.bf16.msra.mxu1 %v3695_v13 }
0x134f   :  { %3233 = vmatmul.mubr.msk.f32.vlgmr.msra.gmra.mrb[14].mxu1 %vm162_vm2, %v2006_v33 }
0x141a   :  { %v2075_v36 = vpop.f32.mrb[12].mxu1 }
0x141b   :  { %v3436_v38 = vadd.f32 %v3788_v51, %v2075_v36  ;;  %v3212_v39 = vpop.f32.mrb[13].mxu1  ;;  %v2383_v36 = vld [vmem:[%s4162_s8] sm:$0xff] }
0x141c   :  { %v2385_v39 = vld [vmem:[%s4162_s8 + $0x10] sm:$0xff] }
0x141d   :  { %2086 = vrot.lane.b32.xlu1 %v3436_v38, %s3586_s24  ;;  %v2828_v45 = vmul.f32 -1.442695, %v3436_v38 }
0x141f   :  { %3541 = vpow2.f32 %v2828_v45 }
0x1422   :  { %v2245_v40 = vpop.f32.mrb[14].mxu1 }
0x1423   :  { %v2259_v42 = vadd.f32 %v2245_v40, %v3710_v18  ;;  %v3234_v43 = vpop.f32.mrb[15].mxu1  ;;  %v2250_v46 = vrot.slane %v2245_v40, 2 }
0x1425   :  { %v2261_v10 = vrot.slane %v2259_v42, 2  ;;  %v2252_v13 = vadd.f32 %v2250_v46, %v3708_v16  ;;  %v2386_v42 = vld [vmem:[%s4162_s8 + $0x18] sm:$0xff] }
0x1426   :  { %v3420_v43 = vpack.c.bf16 %v2386_v42, %v2385_v39 }
0x1427   :  { %2262 = vrot.lane.b32.xlu0 %v2261_v10, %s3584_s19  ;;  %v2831_v47 = vmul.f32 -1.442695, %v2252_v13  ;;  %v2407_v13 = vrot.slane %v4008_v23, 6 }
0x1429   :  { %v3542_v48 = vpop.eup %3541  ;;  %3543 = vpow2.f32 %v2831_v47 }
0x142a   :  { %v2082_v50 = vadd.f32 1.0, %v3542_v48 }
0x142c   :  { %3545 = vrcp.f32 %v2082_v50 }
0x1433   :  { %v3544_v52 = vpop.eup %3543 }
0x1434   :  { %v2256_v53 = vadd.f32 1.0, %v3544_v52 }
0x1436   :  { %v3546_v54 = vpop.eup %3545  ;;  %3547 = vrcp.f32 %v2256_v53 }
0x1437   :  { %v2096_v22 = vsub.f32 1.0, %v3546_v54  ;;  %v2102_v1 = vmul.f32 %v3546_v54, %v4008_v23 }
0x1440   :  { %v3548_v35 = vpop.eup %3547 }
0x1441   :  { %v2280_v8 = vmul.f32 %v3548_v35, %v2278_v6  ;;  %v3587_v6 = vmov 0  }
0x1442   :  { %3462 = vset.pattern.permute.xlu1 %v3587_v6  ;;  %3461 = vset.pattern.permute.xlu0 %v3587_v6 }
0x148f   :  { %v2087_v55 = vpop.permute.xlu1 %2086 }
0x1490   :  { %v2089_v18 = vmul.f32 %v3546_v54, %v2087_v55  ;;  %v2420_v54 = vsel %vm2414_vm3, %v3967_v34, %v2407_v13 }
0x1492   :  { %2091 = vrot.lane.b32.xlu1 %v2089_v18, %s3584_s19 }
0x1499   :  { %v2263_v56 = vpop.permute.xlu0 %2262 }
0x149a   :  { %v2265_v57 = vmul.f32 %v3548_v35, %v2263_v56  ;;  %v2834_v56 = vld [vmem:[%s4163_s9] ss:$0 sm:$0xff] }
0x149c   :  { %2267 = vrot.lane.b32.xlu0 %v2265_v57, %s3584_s19 }
0x1504   :  { %v2092_v37 = vpop.permute.xlu1 %2091 }
0x1505   :  { %v2094_v58 = vadd.f32 %v3436_v38, %v2092_v37  ;;  %v2384_v38 = vld [vmem:[%s4162_s8 + $0x8] sm:$0xff] }
0x1506   :  { %v3416_v40 = vpack.c.bf16 %v2384_v38, %v2383_v36 }
0x1507   :  { %3549 = vtanh.f32 %v2094_v58 }
0x1508   :  { %3417 = vmatprep.subr.bf16.mxu1 %v3416_v40 }
0x1509   :  { %3419 = vmatpush3.bf16.msra.mxu1 %v3416_v40 }
0x150a   :  { %3421 = vmatprep.subr.bf16.mxu1 %v3420_v43 }
0x150d   :  { %3423 = vmatpush3.bf16.msra.mxu1 %v3420_v43 }
0x150e   :  { %v2268_v59 = vpop.permute.xlu0 %2267 }
0x150f   :  { %v2270_v60 = vadd.f32 %v2268_v59, %v3708_v16  ;;  %v2272_v16 = vsub.f32 1.0, %v3548_v35 }
0x1511   :  { %v3550_v61 = vpop.eup %3549  ;;  %3551 = vtanh.f32 %v2270_v60  ;;  %v2835_v60 = vld [vmem:[%s4164_s10] ss:$0 sm:$0xff] }
0x1512   :  { %2098 = vrot.lane.b32.xlu1 %v3550_v61, %s3585_s6 }
0x151b   :  { %v3552_v63 = vpop.eup %3551 }
0x151c   :  { %2274 = vrot.lane.b32.xlu0 %v3552_v63, %s3585_s6 }
0x1584   :  { %v2099_v0 = vpop.permute.xlu1 %2098 }
0x1585   :  { %v2101_v2 = vmul.f32 %v2099_v0, %v2096_v22 }
0x1587   :  { %v4042_v5 = vadd.f32 %v2102_v1, %v2101_v2 }
0x1589   :  { %2105 = vrot.lane.b32.xlu1 %v4042_v5, %s3585_s6  ;;  %v2409_v50 = vrot.slane %v4042_v5, 4 }
0x158b   :  { %v2421_v55 = vsel %vm2416_vm4, %v2420_v54, %v2409_v50 }
0x158e   :  { %v2275_v7 = vpop.permute.xlu0 %2274 }
0x158f   :  { %v2277_v9 = vmul.f32 %v2275_v7, %v2272_v16 }
0x1591   :  { %v2281_v12 = vadd.f32 %v2280_v8, %v2277_v9 }
0x1593   :  { %v2283_v14 = vrot.slane %v2281_v12, 6 }
0x1595   :  { %2284 = vrot.lane.b32.xlu0 %v2283_v14, %s3585_s6 }
0x15fb   :  { %v2106_v15 = vpop.permute.xlu1 %2105 }
0x15fc   :  { %3222 = vmatmul.mubr.msk.f32.vlgmr.msra.gmra.mrb[16].mxu0 %vm162_vm2, %v2106_v15 }
0x15fd   :  { %3412 = vmatpush3.bf16.msra.mxu0 %v3746_v41  ;;  %3243 = vmatprep.mubr.msk.f32.mxu0 %vm3582_vm1, %v3583_v4 }
0x15fe   :  { %3413 = vmatprep.subr.bf16.mxu0 %v3581_v3 }
0x1601   :  { %3415 = vmatpush3.bf16.msra.mxu0 %v3760_v44 }
0x1602   :  { %3424 = vmatprep.subr.bf16.mxu0 %v3581_v3 }
0x1607   :  { %v2285_v17 = vpop.permute.xlu0 %2284 }
0x1608   :  { %3244 = vmatmul.mubr.msk.f32.vlgmr.msra.gmra.mrb[16].mxu0 %vm162_vm2, %v2285_v17 }
0x1609   :  { %3265 = vmatprep.mubr.msk.f32.mxu0 %vm3582_vm1, %v3583_v4  ;;  %v2405_v4 = vrot.slane %v3925_v49, 2 }
0x16db   :  { %v2354_v19 = vpop.f32.mrb[16].mxu0 }
0x16dc   :  { %v3437_v20 = vadd.f32 %v3788_v51, %v2354_v19  ;;  %v3245_v21 = vpop.f32.mrb[17].mxu0  ;;  %v2415_v51 = vsel %vm2414_vm3, %v3800_v26, %v2401_v27 }
0x16dd   :  { %v2417_v31 = vsel %vm2416_vm4, %v2415_v51, %v2403_v29 }
0x16de   :  { %2365 = vrot.lane.b32.xlu1 %v3437_v20, %s3586_s24  ;;  %v2833_v41 = vmul.f32 -1.442695, %v3437_v20  ;;  %v2419_v11 = vsel %vm2418_vm5, %v2417_v31, %v2405_v4 }
0x16e0   :  { %3553 = vpow2.f32 %v2833_v41 }
0x16ea   :  { %v3554_v24 = vpop.eup %3553 }
0x16eb   :  { %v2361_v25 = vadd.f32 1.0, %v3554_v24 }
0x16ed   :  { %3555 = vrcp.f32 %v2361_v25 }
0x16f7   :  { %v3556_v44 = vpop.eup %3555 }
0x16f8   :  { %v2375_v45 = vsub.f32 1.0, %v3556_v44  ;;  %v2381_v47 = vmul.f32 %v3556_v44, %v4042_v5 }
0x1750   :  { %v2366_v28 = vpop.permute.xlu1 %2365 }
0x1751   :  { %v2368_v30 = vmul.f32 %v3556_v44, %v2366_v28 }
0x1753   :  { %2370 = vrot.lane.b32.xlu0 %v2368_v30, %s3584_s19 }
0x1757   :  { %2425 = vrot.lane.b32.xlu0 %v2419_v11, %s3585_s6 }
0x17c5   :  { %v2371_v62 = vpop.permute.xlu0 %2370 }
0x17c6   :  { %v2373_v32 = vadd.f32 %v3437_v20, %v2371_v62 }
0x17c8   :  { %3557 = vtanh.f32 %v2373_v32 }
0x17c9   :  { %v2426_v33 = vpop.permute.xlu0 %2425 }
0x17ca   :  { %3254 = vmatprep.mubr.msk.f32.mxu1 %vm162_vm2, %v2426_v33 }
0x17d2   :  { %v3558_v10 = vpop.eup %3557 }
0x17d3   :  { %2377 = vrot.lane.b32.xlu1 %v3558_v10, %s3585_s6 }
0x1845   :  { %v2378_v46 = vpop.permute.xlu1 %2377 }
0x1846   :  { %v2380_v48 = vmul.f32 %v2378_v46, %v2375_v45 }
0x1848   :  { %v4088_v52 = vadd.f32 %v2381_v47, %v2380_v48 }
0x184a   :  { %v2412_v53 = vrot.slane %v4088_v52, 2 }
0x184c   :  { %v2422_v18 = vsel %vm2418_vm5, %v2421_v55, %v2412_v53 }
0x184d   :  { %2427 = vrot.lane.b32.xlu1 %v2422_v18, %s3585_s6 }
0x18bf   :  { %v2428_v35 = vpop.permute.xlu1 %2427 }
0x18c0   :  { %3255 = vmatmul.mubr.msk.f32.vlgmr.msra.gmra.mrb[16].mxu1 %vm162_vm2, %v2428_v35 }
0x1993   :  { %v3256_v57 = vpop.f32.mrb[16].mxu1 }
0x1994   :  { %v2505_v37 = vadd.f32 %v3256_v57, %v2834_v56  ;;  %v2499_v58 = vpop.f32.mrb[17].mxu1 }
0x1995   :  { %v2500_v59 = vadd.f32 %v2834_v56, %v2499_v58 }
0x1996   :  { %3559 = vtanh.f32 %v2505_v37 }
0x1997   :  { %3561 = vtanh.f32 %v2500_v59 }
0x19a0   :  { %v3560_v61 = vpop.eup %3559 }
0x19a1   :  { %v3562_v63 = vpop.eup %3561  ;;  %v2511_v22 = vmul.f32 %v3560_v61, %v2835_v60 }
0x19a2   :  { %v2510_v0 = vmul.f32 %v3562_v63, %v2835_v60 }
0x19a3   :  { %v2515_v1 = vsel %vm162_vm2, %v2511_v22, 0.0 }
0x19a4   :  { %2516 = vadd.xlane.f32.xlu1 %v2515_v1  ;;  %v2512_v2 = vsel %vm162_vm2, %v2510_v0, 0.0 }
0x19a5   :  { %2513 = vadd.xlane.f32.xlu0 %v2512_v2 }
0x19b5   :  { %2584 = vrot.lane.b32.xlu1 %v2401_v27, %s3585_s6 }
0x19b9   :  { %2602 = vrot.lane.b32.xlu1 %v2403_v29, %s3585_s6 }
0x1a31   :  { %v2517_v15 = vpop.xlane.xlu1 %2516 }
0x1a32   :  { %v2514_v16 = vpop.xlane.xlu0 %2513  ;;  %v2530_v19 = vrot.slane %v2517_v15, 2  ;;  %v2533_v21 = vrot.slane %v2517_v15, 4  ;;  %v2536_v24 = vrot.slane %v2517_v15, 6 }
0x1a33   :  { %v2519_v7 = vrot.slane %v2514_v16, 2  ;;  %v2522_v9 = vrot.slane %v2514_v16, 4  ;;  %v2525_v14 = vrot.slane %v2514_v16, 6 }
0x1a35   :  { %v2521_v8 = vmax.f32 %v2514_v16, %v2519_v7  ;;  %v2585_v5 = vpop.permute.xlu1 %2584 }
0x1a37   :  { %v2524_v12 = vmax.f32 %v2521_v8, %v2522_v9 }
0x1a39   :  { %v2527_v17 = vmax.f32 %v2524_v12, %v2525_v14 }
0x1a3b   :  { %v2528_v20 = vmax.f32 %v2527_v17, %v2517_v15 }
0x1a3d   :  { %v2532_v41 = vmax.f32 %v2528_v20, %v2530_v19 }
0x1a3f   :  { %v2535_v25 = vmax.f32 %v2532_v41, %v2533_v21 }
0x1a41   :  { %v2538_v44 = vmax.f32 %v2535_v25, %v2536_v24 }
0x1a43   :  { %v2539_v27 = vsub.f32 %v2514_v16, %v2538_v44  ;;  %v2543_v28 = vrot.slane %v2538_v44, 6  ;;  %v2548_v29 = vrot.slane %v2538_v44, 4  ;;  %v2553_v30 = vrot.slane %v2538_v44, 2 }
0x1a44   :  { %v2558_v40 = vsub.f32 %v2517_v15, %v2538_v44 }
0x1a45   :  { %v2540_v51 = vmul.f32 1.442695, %v2539_v27  ;;  %v2545_v31 = vsub.f32 %v2514_v16, %v2543_v28  ;;  %v2550_v11 = vsub.f32 %v2514_v16, %v2548_v29  ;;  %v2555_v62 = vsub.f32 %v2514_v16, %v2553_v30  ;;  %v2699_v27 = vld [vmem:[%s4165_s11] sm:$0xff] }
0x1a46   :  { %v2567_v32 = vsub.f32 %v2517_v15, %v2553_v30  ;;  %v2561_v39 = vsub.f32 %v2517_v15, %v2543_v28  ;;  %v2564_v42 = vsub.f32 %v2517_v15, %v2548_v29  ;;  %v2559_v45 = vmul.f32 1.442695, %v2558_v40  ;;  %v2700_v28 = vld [vmem:[%s4165_s11 + $0x8] sm:$0xff]  ;;  %v2701_v29 = vld [vmem:[%s4165_s11 + $0x10] sm:$0xff] }
0x1a47   :  { %v2546_v33 = vmul.f32 1.442695, %v2545_v31  ;;  %v2551_v36 = vmul.f32 1.442695, %v2550_v11  ;;  %v2556_v38 = vmul.f32 1.442695, %v2555_v62  ;;  %3563 = vpow2.f32 %v2540_v51 }
0x1a48   :  { %v2568_v43 = vmul.f32 1.442695, %v2567_v32  ;;  %v2562_v10 = vmul.f32 1.442695, %v2561_v39  ;;  %v2565_v46 = vmul.f32 1.442695, %v2564_v42  ;;  %v3425_v30 = vpack.c.bf16 %v2700_v28, %v2699_v27 }
0x1a49   :  { %3565 = vpow2.f32 %v2546_v33  ;;  %v2702_v51 = vld [vmem:[%s4165_s11 + $0x18] sm:$0xff] }
0x1a4a   :  { %3567 = vpow2.f32 %v2551_v36  ;;  %3426 = vmatpush3.bf16.msra.mxu0 %v3425_v30  ;;  %v3428_v62 = vpack.c.bf16 %v2702_v51, %v2701_v29 }
0x1a4b   :  { %3569 = vpow2.f32 %v2556_v38  ;;  %3427 = vmatprep.subr.bf16.mxu0 %v3581_v3 }
0x1a4c   :  { %3571 = vpow2.f32 %v2568_v43 }
0x1a4d   :  { %3573 = vpow2.f32 %v2562_v10 }
0x1a4e   :  { %3575 = vpow2.f32 %v2559_v45  ;;  %3429 = vmatpush3.bf16.msra.mxu0 %v3428_v62 }
0x1a4f   :  { %3577 = vpow2.f32 %v2565_v46 }
0x1a51   :  { %v3564_v47 = vpop.eup %3563 }
0x1a53   :  { %v3566_v48 = vpop.eup %3565 }
0x1a54   :  { %v3568_v54 = vpop.eup %3567  ;;  %v2577_v55 = vrot.slane %v3566_v48, 2  ;;  %2581 = vperm.xlu0 %3461, %v3566_v48  }
0x1a55   :  { %v3570_v18 = vpop.eup %3569  ;;  %2599 = vperm.xlu1 %3462, %v3568_v54   ;;  %v2595_v56 = vrot.slane %v3568_v54, 4 }
0x1a56   :  { %v2579_v35 = vadd.f32 %v3564_v47, %v2577_v55  ;;  %v3572_v57 = vpop.eup %3571  ;;  %v2613_v58 = vrot.slane %v3570_v18, 6 }
0x1a57   :  { %v3574_v59 = vpop.eup %3573  ;;  %v2675_v16 = vrot.slane %v3572_v57, 6 }
0x1a58   :  { %v2597_v37 = vadd.f32 %v2595_v56, %v2579_v35  ;;  %2679 = vperm.xlu0 %3461, %v3572_v57   ;;  %v3576_v60 = vpop.eup %3575  ;;  %v2639_v0 = vrot.slane %v3574_v59, 2 }
0x1a59   :  { %2617 = vperm.xlu1 %3462, %v3570_v18   ;;  %v3578_v63 = vpop.eup %3577 }
0x1a5a   :  { %v2615_v61 = vadd.f32 %v2613_v58, %v2597_v37  ;;  %v2657_v2 = vrot.slane %v3578_v63, 4  ;;  %v2838_v58 = vld [vmem:[%s4166_s12] ss:$0 sm:$0xff] }
0x1a5c   :  { %2664 = vrot.lane.b32.xlu0 %v2409_v50, %s3585_s6  ;;  %v2630_v22 = vadd.f32 %v3576_v60, %v2615_v61  ;;  %v2603_v50 = vpop.permute.xlu1 %2602 }
0x1a5d   :  { %2643 = vperm.xlu1 %3462, %v3574_v59  }
0x1a5e   :  { %v2641_v1 = vadd.f32 %v2639_v0, %v2630_v22 }
0x1a60   :  { %2572 = vperm.xlu0 %3461, %v3564_v47   ;;  %v2659_v6 = vadd.f32 %v2657_v2, %v2641_v1 }
0x1a61   :  { %2661 = vperm.xlu1 %3462, %v3578_v63  }
0x1a62   :  { %v2677_v7 = vadd.f32 %v2675_v16, %v2659_v6 }
0x1a64   :  { %3579 = vrcp.f32 %v2677_v7 }
0x1a65   :  { %2620 = vrot.lane.b32.xlu1 %v2405_v4, %s3585_s6 }
0x1a69   :  { %2646 = vrot.lane.b32.xlu1 %v2407_v13, %s3585_s6 }
0x1a6d   :  { %2682 = vrot.lane.b32.xlu1 %v2412_v53, %s3585_s6 }
0x1a6e   :  { %v3580_v4 = vpop.eup %3579 }
0x1a71   :  { %2633 = vperm.xlu1 %3462, %v3576_v60  }
0x1ad3   :  { %v2582_v8 = vpop.permute.xlu0 %2581 }
0x1ad4   :  { %v2600_v9 = vpop.permute.xlu1 %2599  ;;  %v2587_v12 = vmul.f32 %v2585_v5, %v2582_v8 }
0x1ad5   :  { %v2605_v14 = vmul.f32 %v2603_v50, %v2600_v9 }
0x1ad6   :  { %v2589_v15 = vrot.slane %v2587_v12, 2 }
0x1ad7   :  { %v2607_v17 = vrot.slane %v2605_v14, 4  ;;  %v2680_v23 = vpop.permute.xlu0 %2679 }
0x1ad8   :  { %v2618_v49 = vpop.permute.xlu1 %2617  ;;  %2590 = vrot.lane.b32.xlu0 %v2589_v15, %s3586_s24 }
0x1ad9   :  { %2608 = vrot.lane.b32.xlu1 %v2607_v17, %s3586_s24 }
0x1adb   :  { %v2665_v52 = vpop.permute.xlu0 %2664 }
0x1adc   :  { %v2644_v13 = vpop.permute.xlu1 %2643 }
0x1add   :  { %2695 = vperm.xlu1 %3462, %v3580_v4  }
0x1adf   :  { %v2573_v36 = vpop.permute.xlu0 %2572 }
0x1ae0   :  { %v2662_v53 = vpop.permute.xlu1 %2661  ;;  %v2575_v39 = vmul.f32 %v2573_v36, %v3800_v26 }
0x1ae1   :  { %v2667_v19 = vmul.f32 %v2665_v52, %v2662_v53 }
0x1ae3   :  { %v2669_v20 = vrot.slane %v2667_v19, 4 }
0x1ae4   :  { %v2621_v21 = vpop.permute.xlu1 %2620 }
0x1ae5   :  { %v2623_v41 = vmul.f32 %v2621_v21, %v2618_v49  ;;  %2670 = vrot.lane.b32.xlu1 %v2669_v20, %s3586_s24 }
0x1ae7   :  { %v2625_v24 = vrot.slane %v2623_v41, 6 }
0x1ae8   :  { %v2647_v25 = vpop.permute.xlu1 %2646 }
0x1ae9   :  { %v2649_v44 = vmul.f32 %v2647_v25, %v2644_v13  ;;  %2626 = vrot.lane.b32.xlu0 %v2625_v24, %s3586_s24 }
0x1aeb   :  { %v2651_v31 = vrot.slane %v2649_v44, 2 }
0x1aec   :  { %v2683_v11 = vpop.permute.xlu1 %2682 }
0x1aed   :  { %v2685_v32 = vmul.f32 %v2683_v11, %v2680_v23  ;;  %2652 = vrot.lane.b32.xlu0 %v2651_v31, %s3586_s24 }
0x1aef   :  { %v2687_v33 = vrot.slane %v2685_v32, 6 }
0x1af0   :  { %v2634_v40 = vpop.permute.xlu1 %2633 }
0x1af1   :  { %2688 = vrot.lane.b32.xlu0 %v2687_v33, %s3586_s24  ;;  %v2636_v46 = vmul.f32 %v2634_v40, %v3967_v34 }
0x1b4a   :  { %v2591_v38 = vpop.permute.xlu0 %2590 }
0x1b4b   :  { %v2593_v42 = vadd.f32 %v2591_v38, %v2575_v39  ;;  %v2609_v43 = vpop.permute.xlu1 %2608 }
0x1b4d   :  { %v2611_v10 = vadd.f32 %v2609_v43, %v2593_v42 }
0x1b5b   :  { %v2627_v45 = vpop.permute.xlu0 %2626 }
0x1b5c   :  { %v2629_v47 = vadd.f32 %v2627_v45, %v2611_v10  ;;  %v2696_v48 = vpop.permute.xlu1 %2695 }
0x1b5e   :  { %v2637_v54 = vadd.f32 %v2636_v46, %v2629_v47 }
0x1b5f   :  { %v2653_v55 = vpop.permute.xlu0 %2652 }
0x1b60   :  { %v2655_v3 = vadd.f32 %v2653_v55, %v2637_v54  ;;  %v2671_v18 = vpop.permute.xlu1 %2670 }
0x1b62   :  { %v2673_v35 = vadd.f32 %v2671_v18, %v2655_v3 }
0x1b63   :  { %v2689_v56 = vpop.permute.xlu0 %2688 }
0x1b64   :  { %v2691_v57 = vadd.f32 %v2689_v56, %v2673_v35 }
0x1b66   :  { %v2698_v37 = vmul.f32 %v2696_v48, %v2691_v57 }
0x1b68   :  { %2711 = vrot.lane.b32.xlu1 %v2698_v37, %s3585_s6 }
0x1bda   :  { %v2712_v26 = vpop.permute.xlu1 %2711 }
0x1bdb   :  { %3266 = vmatmul.mubr.msk.f32.vlgmr.msra.gmra.mrb[18].mxu0 %vm162_vm2, %v2712_v26 }
0x1cae   :  { %v2781_v34 = vpop.f32.mrb[18].mxu0 }
0x1caf   :  { %v2782_v59 = vadd.f32 %v2838_v58, %v2781_v34  ;;  %v3267_v60 = vpop.f32.mrb[19].mxu0 }
0x1cb1   :  { %2786 = vst.msk [vmem:[%s4167_s13] sm:$0x3] %vm2785_vm6, %v2782_v59 }

</bundles_post_ra>
